<compile_context>
chip_gen: v7x
topology: tpu7x:2x2x1
jax: 0.10.0
libtpu: 0.0.40
codegen_flags: <defaults>
</compile_context>

<pallas_src>
import math
import functools

import jax
import jax.numpy as jnp
from jax.experimental import pallas as pl
from jax.experimental.pallas import tpu as pltpu


# ---------------------------------------------------------------------------
# Fused whole-forward Pallas kernel
# ---------------------------------------------------------------------------

def _embedding_fwd_kernel(x_ref, pe_ref,
                          qkv_w_ref, qkv_b_ref, out_w_ref, out_b_ref,
                          ff1_w_ref, ff1_b_ref, ff2_w_ref, ff2_b_ref,
                          ln1_g_ref, ln1_b_ref, ln2_g_ref, ln2_b_ref,
                          ll_w_ref, ll_b_ref, o_ref,
                          *, n_head, n_layers):
    B, S, E = x_ref.shape
    Dout = o_ref.shape[2]
    H = n_head
    Dh = E // H
    scale = 1.0 / math.sqrt(Dh)

    # Causal additive mask, same semantics as _generate_square_subsequent_mask.
    row = jax.lax.broadcasted_iota(jnp.int32, (S, S), 0)
    col = jax.lax.broadcasted_iota(jnp.int32, (S, S), 1)
    mask = jnp.where(col <= row, 0.0, -1e30).astype(jnp.float32)

    def layer_norm(v, g, b):
        mean = jnp.mean(v, axis=-1, keepdims=True)
        var = jnp.mean((v - mean) ** 2, axis=-1, keepdims=True)
        return (v - mean) * jax.lax.rsqrt(var + 1e-5) * g + b   # PyTorch eps default

    # Positional-encoding add (pe broadcasts over batch).
    x = x_ref[...] + pe_ref[...]                 # (B, S, E)
    x2 = x.reshape(B * S, E)                     # 2-D working slab, long axis last

    for l in range(n_layers):                    # static unroll (n_layers is tiny)
        # ---- self-attention: fused QKV projection, one (B*S,E) x (E,3E) matmul
        qkv = jnp.dot(x2, qkv_w_ref[l], preferred_element_type=jnp.float32) + qkv_b_ref[l]
        q = qkv[:, 0 * E:1 * E].reshape(B, S, E)
        k = qkv[:, 1 * E:2 * E].reshape(B, S, E)
        v = qkv[:, 2 * E:3 * E].reshape(B, S, E)

        # ---- causal attention, batched (over B) einsums, static loop over heads
        heads = []
        for h in range(H):
            qh = q[:, :, h * Dh:(h + 1) * Dh]
            kh = k[:, :, h * Dh:(h + 1) * Dh]
            vh = v[:, :, h * Dh:(h + 1) * Dh]
            s = jnp.einsum('bqd,bkd->bqk', qh, kh,
                           preferred_element_type=jnp.float32) * scale
            s = s + mask[None]
            s = s - jnp.max(s, axis=-1, keepdims=True)
            p = jnp.exp(s)
            p = p * pl.reciprocal(jnp.sum(p, axis=-1, keepdims=True), approx=True)
            heads.append(jnp.einsum('bqk,bkd->bqd', p, vh,
                                    preferred_element_type=jnp.float32))
        attn = jnp.concatenate(heads, axis=-1).reshape(B * S, E)
        attn = jnp.dot(attn, out_w_ref[l], preferred_element_type=jnp.float32) + out_b_ref[l]

        # ---- residual + LayerNorm1 (fused)
        x2 = layer_norm(x2 + attn, ln1_g_ref[l], ln1_b_ref[l])

        # ---- feed-forward: linear1 -> relu -> linear2 (bias/relu fused in)
        hdn = jnp.dot(x2, ff1_w_ref[l], preferred_element_type=jnp.float32) + ff1_b_ref[l]
        hdn = jnp.maximum(hdn, 0.0)
        ff = jnp.dot(hdn, ff2_w_ref[l], preferred_element_type=jnp.float32) + ff2_b_ref[l]

        # ---- residual + LayerNorm2 (fused)
        x2 = layer_norm(x2 + ff, ln2_g_ref[l], ln2_b_ref[l])

    # ---- final Linear (self.ll)
    out = jnp.dot(x2, ll_w_ref[...], preferred_element_type=jnp.float32) + ll_b_ref[...]
    o_ref[...] = out.reshape(B, S, Dout).astype(o_ref.dtype)


@functools.partial(jax.jit, static_argnames=('n_head', 'n_layers'))
def embedding_forward(src, params, n_head, n_layers):
    """src: (S, B, E) -> (S, B, dim_output). Single fused pallas_call."""
    S, B, E = src.shape
    dim_out = params['ll_w'].shape[1]

    x_bse = jnp.transpose(src, (1, 0, 2))        # (B, S, E): batch-major for attention
    pe = params['pe'][:S][None]                  # (1, S, E)

    vmem = pl.BlockSpec(memory_space=pltpu.MemorySpace.VMEM)
    out_bsd = pl.pallas_call(
        functools.partial(_embedding_fwd_kernel, n_head=n_head, n_layers=n_layers),
        out_shape=jax.ShapeDtypeStruct((B, S, dim_out), jnp.float32),
        in_specs=[vmem] * 16,
        out_specs=vmem,
    )(x_bse, pe,
      params['qkv_w'], params['qkv_b'], params['out_w'], params['out_b'],
      params['ff1_w'], params['ff1_b'], params['ff2_w'], params['ff2_b'],
      params['ln1_g'], params['ln1_b'], params['ln2_g'], params['ln2_b'],
      params['ll_w'], params['ll_b'])
    return jnp.transpose(out_bsd, (1, 0, 2))     # back to (S, B, dim_out)


# ---------------------------------------------------------------------------
# Pure-JAX reference (for a loose numerical sanity check)
# ---------------------------------------------------------------------------

def embedding_forward_ref(src, params, n_head, n_layers):
    S, B, E = src.shape
    H = n_head
    Dh = E // H
    mask = jnp.where(jnp.arange(S)[None, :] <= jnp.arange(S)[:, None], 0.0, -jnp.inf)

    def ln(v, g, b):
        m = v.mean(-1, keepdims=True)
        var = ((v - m) ** 2).mean(-1, keepdims=True)
        return (v - m) * jax.lax.rsqrt(var + 1e-5) * g + b

    x = src + params['pe'][:S][:, None, :]
    for l in range(n_layers):
        x2 = x.reshape(S * B, E)
        qkv = x2 @ params['qkv_w'][l] + params['qkv_b'][l]
        q, k, v = jnp.split(qkv, 3, axis=-1)

        def heads(t):
            return t.reshape(S, B, H, Dh).transpose(1, 2, 0, 3)   # (B, H, S, Dh)

        qh, kh, vh = heads(q), heads(k), heads(v)
        s = jnp.einsum('bhqd,bhkd->bhqk', qh, kh) / math.sqrt(Dh) + mask
        p = jax.nn.softmax(s, axis=-1)
        a = jnp.einsum('bhqk,bhkd->bhqd', p, vh)
        a = a.transpose(2, 0, 1, 3).reshape(S * B, E)
        a = a @ params['out_w'][l] + params['out_b'][l]
        x2 = ln(x2 + a, params['ln1_g'][l], params['ln1_b'][l])
        h1 = jnp.maximum(x2 @ params['ff1_w'][l] + params['ff1_b'][l], 0.0)
        ff = h1 @ params['ff2_w'][l] + params['ff2_b'][l]
        x2 = ln(x2 + ff, params['ln2_g'][l], params['ln2_b'][l])
        x = x2.reshape(S, B, E)
    out = x.reshape(S * B, E) @ params['ll_w'] + params['ll_b']
    return out.reshape(S, B, -1)


# ---------------------------------------------------------------------------
# Deterministic parameter construction (weights pre-transposed to (in, out))
# ---------------------------------------------------------------------------

def make_pe(E, max_len=1000):
    pos = jnp.arange(max_len, dtype=jnp.float32)[:, None]
    div = jnp.exp(jnp.arange(0, E, 2, dtype=jnp.float32) * (-math.log(10000.0) / E))
    pe = jnp.zeros((max_len, E), jnp.float32)
    pe = pe.at[:, 0::2].set(jnp.sin(pos * div))
    pe = pe.at[:, 1::2].set(jnp.cos(pos * div))
    return pe                                    # (max_len, E)


def _uniform(k, shape, a):
    return jax.random.uniform(k, shape, jnp.float32, -a, a)


def init_params(key, E, n_layers, dim_ff, dim_output):
    params = {'pe': make_pe(E)}
    a = 1.0 / math.sqrt(E)
    keys = jax.random.split(key, 4 * n_layers + 1)
    params['qkv_w'] = jnp.stack([_uniform(keys[4 * i + 0], (E, 3 * E), a)
                                 for i in range(n_layers)])
    params['out_w'] = jnp.stack([_uniform(keys[4 * i + 1], (E, E), a)
                                 for i in range(n_layers)])
    params['ff1_w'] = jnp.stack([_uniform(keys[4 * i + 2], (E, dim_ff), a)
                                 for i in range(n_layers)])
    params['ff2_w'] = jnp.stack([_uniform(keys[4 * i + 3], (dim_ff, E),
                                          1.0 / math.sqrt(dim_ff))
                                 for i in range(n_layers)])
    params['qkv_b'] = jnp.zeros((n_layers, 1, 3 * E), jnp.float32)
    params['out_b'] = jnp.zeros((n_layers, 1, E), jnp.float32)
    params['ff1_b'] = jnp.zeros((n_layers, 1, dim_ff), jnp.float32)
    params['ff2_b'] = jnp.zeros((n_layers, 1, E), jnp.float32)
    params['ln1_g'] = jnp.ones((n_layers, 1, E), jnp.float32)
    params['ln1_b'] = jnp.zeros((n_layers, 1, E), jnp.float32)
    params['ln2_g'] = jnp.ones((n_layers, 1, E), jnp.float32)
    params['ln2_b'] = jnp.zeros((n_layers, 1, E), jnp.float32)
    # self.ll: bias zeroed, weight ~ U(-0.1, 0.1)   (pre-transposed to (E, dim_output))
    params['ll_w'] = _uniform(keys[-1], (E, dim_output), 0.1)
    params['ll_b'] = jnp.zeros((1, dim_output), jnp.float32)
    return params


# ---------------------------------------------------------------------------

if __name__ == "__main__":
    # cfg['t_emb'] analogue: feature_size=32, num_layers=2, n_head=4, dim_output=16,
    # dim_feedforward = feature_size * 8 = 256.
    S, B = 8, 2
    E, H, NUM_LAYERS, DIM_OUT = 32, 4, 2, 16
    FF = E * 8

    key = jax.random.PRNGKey(0)
    kp, ks = jax.random.split(key)

    params = init_params(kp, E, NUM_LAYERS, FF, DIM_OUT)
    src = jax.random.normal(ks, (S, B, E), jnp.float32)       # (seq, batch, feature)

    out = embedding_forward(src, params, n_head=H, n_layers=NUM_LAYERS)
    out = jax.block_until_ready(out)

    assert out.shape == (S, B, DIM_OUT), out.shape
    assert bool(jnp.all(jnp.isfinite(out)))

    # Loose sanity check against the pure-JAX reference (approx reciprocal in
    # the kernel's softmax introduces ~1e-4-level relative differences).
    ref = embedding_forward_ref(src, params, H, NUM_LAYERS)
    assert bool(jnp.max(jnp.abs(out - ref)) < 2e-2), float(jnp.max(jnp.abs(out - ref)))

    print("KERNEL_OK")
</pallas_src>

<mosaic_0001>
module attributes {stable_mosaic.version = 11 : i64} {
  func.func @_embedding_fwd_kernel(%arg0: memref<2x8x32xf32, #tpu.memory_space<vmem>>, %arg1: memref<1x8x32xf32, #tpu.memory_space<vmem>>, %arg2: memref<2x32x96xf32, #tpu.memory_space<vmem>>, %arg3: memref<2x1x96xf32, #tpu.memory_space<vmem>>, %arg4: memref<2x32x32xf32, #tpu.memory_space<vmem>>, %arg5: memref<2x1x32xf32, #tpu.memory_space<vmem>>, %arg6: memref<2x32x256xf32, #tpu.memory_space<vmem>>, %arg7: memref<2x1x256xf32, #tpu.memory_space<vmem>>, %arg8: memref<2x256x32xf32, #tpu.memory_space<vmem>>, %arg9: memref<2x1x32xf32, #tpu.memory_space<vmem>>, %arg10: memref<2x1x32xf32, #tpu.memory_space<vmem>>, %arg11: memref<2x1x32xf32, #tpu.memory_space<vmem>>, %arg12: memref<2x1x32xf32, #tpu.memory_space<vmem>>, %arg13: memref<2x1x32xf32, #tpu.memory_space<vmem>>, %arg14: memref<32x16xf32, #tpu.memory_space<vmem>>, %arg15: memref<1x16xf32, #tpu.memory_space<vmem>>, %arg16: memref<2x8x16xf32, #tpu.memory_space<vmem>>) attributes {dimension_semantics = [], scalar_prefetch = 0 : i64, scratch_operands = 0 : i64, tpu.core_type = #tpu.core_type<tc>} {
    %0 = tpu.iota {dimensions = array<i32: 0>} : vector<8x8xi32>
    %1 = tpu.iota {dimensions = array<i32: 1>} : vector<8x8xi32>
    %2 = arith.cmpi sle, %1, %0 : vector<8x8xi32>
    %cst = arith.constant 0.000000e+00 : f32
    %cst_0 = arith.constant -1.000000e+30 : f32
    %3 = vector.broadcast %cst : f32 to vector<8x8xf32>
    %4 = vector.broadcast %cst_0 : f32 to vector<8x8xf32>
    %5 = arith.select %2, %3, %4 : vector<8x8xi1>, vector<8x8xf32>
    %c0 = arith.constant 0 : index
    %c0_1 = arith.constant 0 : index
    %c0_2 = arith.constant 0 : index
    %6 = vector.load %arg0[%c0, %c0_1, %c0_2] : memref<2x8x32xf32, #tpu.memory_space<vmem>>, vector<2x8x32xf32>
    %c0_3 = arith.constant 0 : index
    %c0_4 = arith.constant 0 : index
    %c0_5 = arith.constant 0 : index
    %7 = vector.load %arg1[%c0_3, %c0_4, %c0_5] : memref<1x8x32xf32, #tpu.memory_space<vmem>>, vector<1x8x32xf32>
    %8 = vector.broadcast %7 : vector<1x8x32xf32> to vector<2x8x32xf32>
    %9 = arith.addf %6, %8 : vector<2x8x32xf32>
    %10 = vector.shape_cast %9 : vector<2x8x32xf32> to vector<16x32xf32>
    %c0_6 = arith.constant 0 : index
    %c0_7 = arith.constant 0 : index
    %c0_8 = arith.constant 0 : index
    %11 = vector.load %arg2[%c0_6, %c0_7, %c0_8] : memref<2x32x96xf32, #tpu.memory_space<vmem>>, vector<1x32x96xf32>
    %12 = vector.shape_cast %11 : vector<1x32x96xf32> to vector<32x96xf32>
    %cst_9 = arith.constant dense<0.000000e+00> : vector<16x96xf32>
    %13 = tpu.matmul %10, %12, %cst_9 {dimension_numbers = #tpu.dot_dimension_numbers<[1], [0], [0], [1], [0, 0, 1, 1], [], []>} : vector<16x32xf32>, vector<32x96xf32>, vector<16x96xf32> -> vector<16x96xf32>
    %c0_10 = arith.constant 0 : index
    %c0_11 = arith.constant 0 : index
    %c0_12 = arith.constant 0 : index
    %14 = vector.load %arg3[%c0_10, %c0_11, %c0_12] : memref<2x1x96xf32, #tpu.memory_space<vmem>>, vector<1x1x96xf32>
    %15 = vector.shape_cast %14 : vector<1x1x96xf32> to vector<1x96xf32>
    %16 = vector.broadcast %15 : vector<1x96xf32> to vector<16x96xf32>
    %17 = arith.addf %13, %16 : vector<16x96xf32>
    %18 = vector.extract_strided_slice %17 {offsets = [0, 0], sizes = [16, 32], strides = [1, 1]} : vector<16x96xf32> to vector<16x32xf32>
    %19 = vector.shape_cast %18 : vector<16x32xf32> to vector<2x8x32xf32>
    %20 = vector.extract_strided_slice %17 {offsets = [0, 32], sizes = [16, 32], strides = [1, 1]} : vector<16x96xf32> to vector<16x32xf32>
    %21 = vector.shape_cast %20 : vector<16x32xf32> to vector<2x8x32xf32>
    %22 = vector.extract_strided_slice %17 {offsets = [0, 64], sizes = [16, 32], strides = [1, 1]} : vector<16x96xf32> to vector<16x32xf32>
    %23 = vector.shape_cast %22 : vector<16x32xf32> to vector<2x8x32xf32>
    %24 = vector.extract_strided_slice %19 {offsets = [0, 0, 0], sizes = [2, 8, 8], strides = [1, 1, 1]} : vector<2x8x32xf32> to vector<2x8x8xf32>
    %25 = vector.extract_strided_slice %21 {offsets = [0, 0, 0], sizes = [2, 8, 8], strides = [1, 1, 1]} : vector<2x8x32xf32> to vector<2x8x8xf32>
    %26 = vector.extract_strided_slice %23 {offsets = [0, 0, 0], sizes = [2, 8, 8], strides = [1, 1, 1]} : vector<2x8x32xf32> to vector<2x8x8xf32>
    "tpu.trace_start"() <{level = 10 : i32, message = "bqd,bkd->bqk"}> : () -> ()
    %cst_13 = arith.constant dense<0.000000e+00> : vector<2x8x8xf32>
    %27 = tpu.matmul %24, %25, %cst_13 {dimension_numbers = #tpu.dot_dimension_numbers<[2], [2], [1], [1], [0, 0, 0, 1, 1, 1], [0], [0]>} : vector<2x8x8xf32>, vector<2x8x8xf32>, vector<2x8x8xf32> -> vector<2x8x8xf32>
    "tpu.trace_stop"() : () -> ()
    %cst_14 = arith.constant 0.353553385 : f32
    %28 = vector.broadcast %cst_14 : f32 to vector<2x8x8xf32>
    %29 = arith.mulf %27, %28 : vector<2x8x8xf32>
    %30 = vector.shape_cast %5 : vector<8x8xf32> to vector<1x8x8xf32>
    %31 = vector.broadcast %30 : vector<1x8x8xf32> to vector<2x8x8xf32>
    %32 = arith.addf %29, %31 : vector<2x8x8xf32>
    %cst_15 = arith.constant dense<0xFF800000> : vector<2x8xf32>
    %33 = vector.multi_reduction <maximumf>, %32, %cst_15 [2] : vector<2x8x8xf32> to vector<2x8xf32>
    %34 = vector.shape_cast %33 : vector<2x8xf32> to vector<2x8x1xf32>
    %35 = vector.broadcast %34 : vector<2x8x1xf32> to vector<2x8x8xf32>
    %36 = arith.subf %32, %35 : vector<2x8x8xf32>
    %37 = math.exp %36 : vector<2x8x8xf32>
    %cst_16 = arith.constant dense<0.000000e+00> : vector<2x8xf32>
    %38 = vector.multi_reduction <add>, %37, %cst_16 [2] : vector<2x8x8xf32> to vector<2x8xf32>
    %39 = vector.shape_cast %38 : vector<2x8xf32> to vector<2x8x1xf32>
    %40 = tpu.reciprocal %39 {approx = true} : vector<2x8x1xf32> -> vector<2x8x1xf32>
    %41 = vector.broadcast %40 : vector<2x8x1xf32> to vector<2x8x8xf32>
    %42 = arith.mulf %37, %41 : vector<2x8x8xf32>
    "tpu.trace_start"() <{level = 10 : i32, message = "bqk,bkd->bqd"}> : () -> ()
    %cst_17 = arith.constant dense<0.000000e+00> : vector<2x8x8xf32>
    %43 = tpu.matmul %42, %26, %cst_17 {dimension_numbers = #tpu.dot_dimension_numbers<[2], [1], [1], [2], [0, 0, 0, 1, 1, 2], [0], [0]>} : vector<2x8x8xf32>, vector<2x8x8xf32>, vector<2x8x8xf32> -> vector<2x8x8xf32>
    "tpu.trace_stop"() : () -> ()
    %44 = vector.extract_strided_slice %19 {offsets = [0, 0, 8], sizes = [2, 8, 8], strides = [1, 1, 1]} : vector<2x8x32xf32> to vector<2x8x8xf32>
    %45 = vector.extract_strided_slice %21 {offsets = [0, 0, 8], sizes = [2, 8, 8], strides = [1, 1, 1]} : vector<2x8x32xf32> to vector<2x8x8xf32>
    %46 = vector.extract_strided_slice %23 {offsets = [0, 0, 8], sizes = [2, 8, 8], strides = [1, 1, 1]} : vector<2x8x32xf32> to vector<2x8x8xf32>
    "tpu.trace_start"() <{level = 10 : i32, message = "bqd,bkd->bqk"}> : () -> ()
    %cst_18 = arith.constant dense<0.000000e+00> : vector<2x8x8xf32>
    %47 = tpu.matmul %44, %45, %cst_18 {dimension_numbers = #tpu.dot_dimension_numbers<[2], [2], [1], [1], [0, 0, 0, 1, 1, 1], [0], [0]>} : vector<2x8x8xf32>, vector<2x8x8xf32>, vector<2x8x8xf32> -> vector<2x8x8xf32>
    "tpu.trace_stop"() : () -> ()
    %cst_19 = arith.constant 0.353553385 : f32
    %48 = vector.broadcast %cst_19 : f32 to vector<2x8x8xf32>
    %49 = arith.mulf %47, %48 : vector<2x8x8xf32>
    %50 = vector.shape_cast %5 : vector<8x8xf32> to vector<1x8x8xf32>
    %51 = vector.broadcast %50 : vector<1x8x8xf32> to vector<2x8x8xf32>
    %52 = arith.addf %49, %51 : vector<2x8x8xf32>
    %cst_20 = arith.constant dense<0xFF800000> : vector<2x8xf32>
    %53 = vector.multi_reduction <maximumf>, %52, %cst_20 [2] : vector<2x8x8xf32> to vector<2x8xf32>
    %54 = vector.shape_cast %53 : vector<2x8xf32> to vector<2x8x1xf32>
    %55 = vector.broadcast %54 : vector<2x8x1xf32> to vector<2x8x8xf32>
    %56 = arith.subf %52, %55 : vector<2x8x8xf32>
    %57 = math.exp %56 : vector<2x8x8xf32>
    %cst_21 = arith.constant dense<0.000000e+00> : vector<2x8xf32>
    %58 = vector.multi_reduction <add>, %57, %cst_21 [2] : vector<2x8x8xf32> to vector<2x8xf32>
    %59 = vector.shape_cast %58 : vector<2x8xf32> to vector<2x8x1xf32>
    %60 = tpu.reciprocal %59 {approx = true} : vector<2x8x1xf32> -> vector<2x8x1xf32>
    %61 = vector.broadcast %60 : vector<2x8x1xf32> to vector<2x8x8xf32>
    %62 = arith.mulf %57, %61 : vector<2x8x8xf32>
    "tpu.trace_start"() <{level = 10 : i32, message = "bqk,bkd->bqd"}> : () -> ()
    %cst_22 = arith.constant dense<0.000000e+00> : vector<2x8x8xf32>
    %63 = tpu.matmul %62, %46, %cst_22 {dimension_numbers = #tpu.dot_dimension_numbers<[2], [1], [1], [2], [0, 0, 0, 1, 1, 2], [0], [0]>} : vector<2x8x8xf32>, vector<2x8x8xf32>, vector<2x8x8xf32> -> vector<2x8x8xf32>
    "tpu.trace_stop"() : () -> ()
    %64 = vector.extract_strided_slice %19 {offsets = [0, 0, 16], sizes = [2, 8, 8], strides = [1, 1, 1]} : vector<2x8x32xf32> to vector<2x8x8xf32>
    %65 = vector.extract_strided_slice %21 {offsets = [0, 0, 16], sizes = [2, 8, 8], strides = [1, 1, 1]} : vector<2x8x32xf32> to vector<2x8x8xf32>
    %66 = vector.extract_strided_slice %23 {offsets = [0, 0, 16], sizes = [2, 8, 8], strides = [1, 1, 1]} : vector<2x8x32xf32> to vector<2x8x8xf32>
    "tpu.trace_start"() <{level = 10 : i32, message = "bqd,bkd->bqk"}> : () -> ()
    %cst_23 = arith.constant dense<0.000000e+00> : vector<2x8x8xf32>
    %67 = tpu.matmul %64, %65, %cst_23 {dimension_numbers = #tpu.dot_dimension_numbers<[2], [2], [1], [1], [0, 0, 0, 1, 1, 1], [0], [0]>} : vector<2x8x8xf32>, vector<2x8x8xf32>, vector<2x8x8xf32> -> vector<2x8x8xf32>
    "tpu.trace_stop"() : () -> ()
    %cst_24 = arith.constant 0.353553385 : f32
    %68 = vector.broadcast %cst_24 : f32 to vector<2x8x8xf32>
    %69 = arith.mulf %67, %68 : vector<2x8x8xf32>
    %70 = vector.shape_cast %5 : vector<8x8xf32> to vector<1x8x8xf32>
    %71 = vector.broadcast %70 : vector<1x8x8xf32> to vector<2x8x8xf32>
    %72 = arith.addf %69, %71 : vector<2x8x8xf32>
    %cst_25 = arith.constant dense<0xFF800000> : vector<2x8xf32>
    %73 = vector.multi_reduction <maximumf>, %72, %cst_25 [2] : vector<2x8x8xf32> to vector<2x8xf32>
    %74 = vector.shape_cast %73 : vector<2x8xf32> to vector<2x8x1xf32>
    %75 = vector.broadcast %74 : vector<2x8x1xf32> to vector<2x8x8xf32>
    %76 = arith.subf %72, %75 : vector<2x8x8xf32>
    %77 = math.exp %76 : vector<2x8x8xf32>
    %cst_26 = arith.constant dense<0.000000e+00> : vector<2x8xf32>
    %78 = vector.multi_reduction <add>, %77, %cst_26 [2] : vector<2x8x8xf32> to vector<2x8xf32>
    %79 = vector.shape_cast %78 : vector<2x8xf32> to vector<2x8x1xf32>
    %80 = tpu.reciprocal %79 {approx = true} : vector<2x8x1xf32> -> vector<2x8x1xf32>
    %81 = vector.broadcast %80 : vector<2x8x1xf32> to vector<2x8x8xf32>
    %82 = arith.mulf %77, %81 : vector<2x8x8xf32>
    "tpu.trace_start"() <{level = 10 : i32, message = "bqk,bkd->bqd"}> : () -> ()
    %cst_27 = arith.constant dense<0.000000e+00> : vector<2x8x8xf32>
    %83 = tpu.matmul %82, %66, %cst_27 {dimension_numbers = #tpu.dot_dimension_numbers<[2], [1], [1], [2], [0, 0, 0, 1, 1, 2], [0], [0]>} : vector<2x8x8xf32>, vector<2x8x8xf32>, vector<2x8x8xf32> -> vector<2x8x8xf32>
    "tpu.trace_stop"() : () -> ()
    %84 = vector.extract_strided_slice %19 {offsets = [0, 0, 24], sizes = [2, 8, 8], strides = [1, 1, 1]} : vector<2x8x32xf32> to vector<2x8x8xf32>
    %85 = vector.extract_strided_slice %21 {offsets = [0, 0, 24], sizes = [2, 8, 8], strides = [1, 1, 1]} : vector<2x8x32xf32> to vector<2x8x8xf32>
    %86 = vector.extract_strided_slice %23 {offsets = [0, 0, 24], sizes = [2, 8, 8], strides = [1, 1, 1]} : vector<2x8x32xf32> to vector<2x8x8xf32>
    "tpu.trace_start"() <{level = 10 : i32, message = "bqd,bkd->bqk"}> : () -> ()
    %cst_28 = arith.constant dense<0.000000e+00> : vector<2x8x8xf32>
    %87 = tpu.matmul %84, %85, %cst_28 {dimension_numbers = #tpu.dot_dimension_numbers<[2], [2], [1], [1], [0, 0, 0, 1, 1, 1], [0], [0]>} : vector<2x8x8xf32>, vector<2x8x8xf32>, vector<2x8x8xf32> -> vector<2x8x8xf32>
    "tpu.trace_stop"() : () -> ()
    %cst_29 = arith.constant 0.353553385 : f32
    %88 = vector.broadcast %cst_29 : f32 to vector<2x8x8xf32>
    %89 = arith.mulf %87, %88 : vector<2x8x8xf32>
    %90 = vector.shape_cast %5 : vector<8x8xf32> to vector<1x8x8xf32>
    %91 = vector.broadcast %90 : vector<1x8x8xf32> to vector<2x8x8xf32>
    %92 = arith.addf %89, %91 : vector<2x8x8xf32>
    %cst_30 = arith.constant dense<0xFF800000> : vector<2x8xf32>
    %93 = vector.multi_reduction <maximumf>, %92, %cst_30 [2] : vector<2x8x8xf32> to vector<2x8xf32>
    %94 = vector.shape_cast %93 : vector<2x8xf32> to vector<2x8x1xf32>
    %95 = vector.broadcast %94 : vector<2x8x1xf32> to vector<2x8x8xf32>
    %96 = arith.subf %92, %95 : vector<2x8x8xf32>
    %97 = math.exp %96 : vector<2x8x8xf32>
    %cst_31 = arith.constant dense<0.000000e+00> : vector<2x8xf32>
    %98 = vector.multi_reduction <add>, %97, %cst_31 [2] : vector<2x8x8xf32> to vector<2x8xf32>
    %99 = vector.shape_cast %98 : vector<2x8xf32> to vector<2x8x1xf32>
    %100 = tpu.reciprocal %99 {approx = true} : vector<2x8x1xf32> -> vector<2x8x1xf32>
    %101 = vector.broadcast %100 : vector<2x8x1xf32> to vector<2x8x8xf32>
    %102 = arith.mulf %97, %101 : vector<2x8x8xf32>
    "tpu.trace_start"() <{level = 10 : i32, message = "bqk,bkd->bqd"}> : () -> ()
    %cst_32 = arith.constant dense<0.000000e+00> : vector<2x8x8xf32>
    %103 = tpu.matmul %102, %86, %cst_32 {dimension_numbers = #tpu.dot_dimension_numbers<[2], [1], [1], [2], [0, 0, 0, 1, 1, 2], [0], [0]>} : vector<2x8x8xf32>, vector<2x8x8xf32>, vector<2x8x8xf32> -> vector<2x8x8xf32>
    "tpu.trace_stop"() : () -> ()
    %104 = tpu.concatenate %43, %63, %83, %103 in 2 : vector<2x8x8xf32>, vector<2x8x8xf32>, vector<2x8x8xf32>, vector<2x8x8xf32> -> vector<2x8x32xf32>
    %105 = vector.shape_cast %104 : vector<2x8x32xf32> to vector<16x32xf32>
    %c0_33 = arith.constant 0 : index
    %c0_34 = arith.constant 0 : index
    %c0_35 = arith.constant 0 : index
    %106 = vector.load %arg4[%c0_33, %c0_34, %c0_35] : memref<2x32x32xf32, #tpu.memory_space<vmem>>, vector<1x32x32xf32>
    %107 = vector.shape_cast %106 : vector<1x32x32xf32> to vector<32x32xf32>
    %cst_36 = arith.constant dense<0.000000e+00> : vector<16x32xf32>
    %108 = tpu.matmul %105, %107, %cst_36 {dimension_numbers = #tpu.dot_dimension_numbers<[1], [0], [0], [1], [0, 0, 1, 1], [], []>} : vector<16x32xf32>, vector<32x32xf32>, vector<16x32xf32> -> vector<16x32xf32>
    %c0_37 = arith.constant 0 : index
    %c0_38 = arith.constant 0 : index
    %c0_39 = arith.constant 0 : index
    %109 = vector.load %arg5[%c0_37, %c0_38, %c0_39] : memref<2x1x32xf32, #tpu.memory_space<vmem>>, vector<1x1x32xf32>
    %110 = vector.shape_cast %109 : vector<1x1x32xf32> to vector<1x32xf32>
    %111 = vector.broadcast %110 : vector<1x32xf32> to vector<16x32xf32>
    %112 = arith.addf %108, %111 : vector<16x32xf32>
    %113 = arith.addf %10, %112 : vector<16x32xf32>
    %c0_40 = arith.constant 0 : index
    %c0_41 = arith.constant 0 : index
    %c0_42 = arith.constant 0 : index
    %114 = vector.load %arg10[%c0_40, %c0_41, %c0_42] : memref<2x1x32xf32, #tpu.memory_space<vmem>>, vector<1x1x32xf32>
    %115 = vector.shape_cast %114 : vector<1x1x32xf32> to vector<1x32xf32>
    %c0_43 = arith.constant 0 : index
    %c0_44 = arith.constant 0 : index
    %c0_45 = arith.constant 0 : index
    %116 = vector.load %arg11[%c0_43, %c0_44, %c0_45] : memref<2x1x32xf32, #tpu.memory_space<vmem>>, vector<1x1x32xf32>
    %117 = vector.shape_cast %116 : vector<1x1x32xf32> to vector<1x32xf32>
    %cst_46 = arith.constant dense<0.000000e+00> : vector<16xf32>
    %118 = vector.multi_reduction <add>, %113, %cst_46 [1] : vector<16x32xf32> to vector<16xf32>
    %119 = vector.shape_cast %118 : vector<16xf32> to vector<16x1xf32>
    %cst_47 = arith.constant 3.200000e+01 : f32
    %120 = vector.broadcast %cst_47 : f32 to vector<16x1xf32>
    %121 = arith.divf %119, %120 : vector<16x1xf32>
    %122 = vector.broadcast %121 : vector<16x1xf32> to vector<16x32xf32>
    %123 = arith.subf %113, %122 : vector<16x32xf32>
    %124 = arith.mulf %123, %123 : vector<16x32xf32>
    %cst_48 = arith.constant dense<0.000000e+00> : vector<16xf32>
    %125 = vector.multi_reduction <add>, %124, %cst_48 [1] : vector<16x32xf32> to vector<16xf32>
    %126 = vector.shape_cast %125 : vector<16xf32> to vector<16x1xf32>
    %cst_49 = arith.constant 3.200000e+01 : f32
    %127 = vector.broadcast %cst_49 : f32 to vector<16x1xf32>
    %128 = arith.divf %126, %127 : vector<16x1xf32>
    %129 = vector.broadcast %121 : vector<16x1xf32> to vector<16x32xf32>
    %130 = arith.subf %113, %129 : vector<16x32xf32>
    %cst_50 = arith.constant 9.99999974E-6 : f32
    %131 = vector.broadcast %cst_50 : f32 to vector<16x1xf32>
    %132 = arith.addf %128, %131 : vector<16x1xf32>
    %133 = math.rsqrt %132 : vector<16x1xf32>
    %134 = vector.broadcast %133 : vector<16x1xf32> to vector<16x32xf32>
    %135 = arith.mulf %130, %134 : vector<16x32xf32>
    %136 = vector.broadcast %115 : vector<1x32xf32> to vector<16x32xf32>
    %137 = arith.mulf %135, %136 : vector<16x32xf32>
    %138 = vector.broadcast %117 : vector<1x32xf32> to vector<16x32xf32>
    %139 = arith.addf %137, %138 : vector<16x32xf32>
    %c0_51 = arith.constant 0 : index
    %c0_52 = arith.constant 0 : index
    %c0_53 = arith.constant 0 : index
    %140 = vector.load %arg6[%c0_51, %c0_52, %c0_53] : memref<2x32x256xf32, #tpu.memory_space<vmem>>, vector<1x32x256xf32>
    %141 = vector.shape_cast %140 : vector<1x32x256xf32> to vector<32x256xf32>
    %cst_54 = arith.constant dense<0.000000e+00> : vector<16x256xf32>
    %142 = tpu.matmul %139, %141, %cst_54 {dimension_numbers = #tpu.dot_dimension_numbers<[1], [0], [0], [1], [0, 0, 1, 1], [], []>} : vector<16x32xf32>, vector<32x256xf32>, vector<16x256xf32> -> vector<16x256xf32>
    %c0_55 = arith.constant 0 : index
    %c0_56 = arith.constant 0 : index
    %c0_57 = arith.constant 0 : index
    %143 = vector.load %arg7[%c0_55, %c0_56, %c0_57] : memref<2x1x256xf32, #tpu.memory_space<vmem>>, vector<1x1x256xf32>
    %144 = vector.shape_cast %143 : vector<1x1x256xf32> to vector<1x256xf32>
    %145 = vector.broadcast %144 : vector<1x256xf32> to vector<16x256xf32>
    %146 = arith.addf %142, %145 : vector<16x256xf32>
    %cst_58 = arith.constant 0.000000e+00 : f32
    %147 = vector.broadcast %cst_58 : f32 to vector<16x256xf32>
    %148 = arith.maximumf %146, %147 : vector<16x256xf32>
    %c0_59 = arith.constant 0 : index
    %c0_60 = arith.constant 0 : index
    %c0_61 = arith.constant 0 : index
    %149 = vector.load %arg8[%c0_59, %c0_60, %c0_61] : memref<2x256x32xf32, #tpu.memory_space<vmem>>, vector<1x256x32xf32>
    %150 = vector.shape_cast %149 : vector<1x256x32xf32> to vector<256x32xf32>
    %cst_62 = arith.constant dense<0.000000e+00> : vector<16x32xf32>
    %151 = tpu.matmul %148, %150, %cst_62 {dimension_numbers = #tpu.dot_dimension_numbers<[1], [0], [0], [1], [0, 0, 1, 1], [], []>} : vector<16x256xf32>, vector<256x32xf32>, vector<16x32xf32> -> vector<16x32xf32>
    %c0_63 = arith.constant 0 : index
    %c0_64 = arith.constant 0 : index
    %c0_65 = arith.constant 0 : index
    %152 = vector.load %arg9[%c0_63, %c0_64, %c0_65] : memref<2x1x32xf32, #tpu.memory_space<vmem>>, vector<1x1x32xf32>
    %153 = vector.shape_cast %152 : vector<1x1x32xf32> to vector<1x32xf32>
    %154 = vector.broadcast %153 : vector<1x32xf32> to vector<16x32xf32>
    %155 = arith.addf %151, %154 : vector<16x32xf32>
    %156 = arith.addf %139, %155 : vector<16x32xf32>
    %c0_66 = arith.constant 0 : index
    %c0_67 = arith.constant 0 : index
    %c0_68 = arith.constant 0 : index
    %157 = vector.load %arg12[%c0_66, %c0_67, %c0_68] : memref<2x1x32xf32, #tpu.memory_space<vmem>>, vector<1x1x32xf32>
    %158 = vector.shape_cast %157 : vector<1x1x32xf32> to vector<1x32xf32>
    %c0_69 = arith.constant 0 : index
    %c0_70 = arith.constant 0 : index
    %c0_71 = arith.constant 0 : index
    %159 = vector.load %arg13[%c0_69, %c0_70, %c0_71] : memref<2x1x32xf32, #tpu.memory_space<vmem>>, vector<1x1x32xf32>
    %160 = vector.shape_cast %159 : vector<1x1x32xf32> to vector<1x32xf32>
    %cst_72 = arith.constant dense<0.000000e+00> : vector<16xf32>
    %161 = vector.multi_reduction <add>, %156, %cst_72 [1] : vector<16x32xf32> to vector<16xf32>
    %162 = vector.shape_cast %161 : vector<16xf32> to vector<16x1xf32>
    %cst_73 = arith.constant 3.200000e+01 : f32
    %163 = vector.broadcast %cst_73 : f32 to vector<16x1xf32>
    %164 = arith.divf %162, %163 : vector<16x1xf32>
    %165 = vector.broadcast %164 : vector<16x1xf32> to vector<16x32xf32>
    %166 = arith.subf %156, %165 : vector<16x32xf32>
    %167 = arith.mulf %166, %166 : vector<16x32xf32>
    %cst_74 = arith.constant dense<0.000000e+00> : vector<16xf32>
    %168 = vector.multi_reduction <add>, %167, %cst_74 [1] : vector<16x32xf32> to vector<16xf32>
    %169 = vector.shape_cast %168 : vector<16xf32> to vector<16x1xf32>
    %cst_75 = arith.constant 3.200000e+01 : f32
    %170 = vector.broadcast %cst_75 : f32 to vector<16x1xf32>
    %171 = arith.divf %169, %170 : vector<16x1xf32>
    %172 = vector.broadcast %164 : vector<16x1xf32> to vector<16x32xf32>
    %173 = arith.subf %156, %172 : vector<16x32xf32>
    %cst_76 = arith.constant 9.99999974E-6 : f32
    %174 = vector.broadcast %cst_76 : f32 to vector<16x1xf32>
    %175 = arith.addf %171, %174 : vector<16x1xf32>
    %176 = math.rsqrt %175 : vector<16x1xf32>
    %177 = vector.broadcast %176 : vector<16x1xf32> to vector<16x32xf32>
    %178 = arith.mulf %173, %177 : vector<16x32xf32>
    %179 = vector.broadcast %158 : vector<1x32xf32> to vector<16x32xf32>
    %180 = arith.mulf %178, %179 : vector<16x32xf32>
    %181 = vector.broadcast %160 : vector<1x32xf32> to vector<16x32xf32>
    %182 = arith.addf %180, %181 : vector<16x32xf32>
    %c1 = arith.constant 1 : index
    %c0_77 = arith.constant 0 : index
    %c0_78 = arith.constant 0 : index
    %183 = vector.load %arg2[%c1, %c0_77, %c0_78] : memref<2x32x96xf32, #tpu.memory_space<vmem>>, vector<1x32x96xf32>
    %184 = vector.shape_cast %183 : vector<1x32x96xf32> to vector<32x96xf32>
    %cst_79 = arith.constant dense<0.000000e+00> : vector<16x96xf32>
    %185 = tpu.matmul %182, %184, %cst_79 {dimension_numbers = #tpu.dot_dimension_numbers<[1], [0], [0], [1], [0, 0, 1, 1], [], []>} : vector<16x32xf32>, vector<32x96xf32>, vector<16x96xf32> -> vector<16x96xf32>
    %c1_80 = arith.constant 1 : index
    %c0_81 = arith.constant 0 : index
    %c0_82 = arith.constant 0 : index
    %186 = vector.load %arg3[%c1_80, %c0_81, %c0_82] : memref<2x1x96xf32, #tpu.memory_space<vmem>>, vector<1x1x96xf32>
    %187 = vector.shape_cast %186 : vector<1x1x96xf32> to vector<1x96xf32>
    %188 = vector.broadcast %187 : vector<1x96xf32> to vector<16x96xf32>
    %189 = arith.addf %185, %188 : vector<16x96xf32>
    %190 = vector.extract_strided_slice %189 {offsets = [0, 0], sizes = [16, 32], strides = [1, 1]} : vector<16x96xf32> to vector<16x32xf32>
    %191 = vector.shape_cast %190 : vector<16x32xf32> to vector<2x8x32xf32>
    %192 = vector.extract_strided_slice %189 {offsets = [0, 32], sizes = [16, 32], strides = [1, 1]} : vector<16x96xf32> to vector<16x32xf32>
    %193 = vector.shape_cast %192 : vector<16x32xf32> to vector<2x8x32xf32>
    %194 = vector.extract_strided_slice %189 {offsets = [0, 64], sizes = [16, 32], strides = [1, 1]} : vector<16x96xf32> to vector<16x32xf32>
    %195 = vector.shape_cast %194 : vector<16x32xf32> to vector<2x8x32xf32>
    %196 = vector.extract_strided_slice %191 {offsets = [0, 0, 0], sizes = [2, 8, 8], strides = [1, 1, 1]} : vector<2x8x32xf32> to vector<2x8x8xf32>
    %197 = vector.extract_strided_slice %193 {offsets = [0, 0, 0], sizes = [2, 8, 8], strides = [1, 1, 1]} : vector<2x8x32xf32> to vector<2x8x8xf32>
    %198 = vector.extract_strided_slice %195 {offsets = [0, 0, 0], sizes = [2, 8, 8], strides = [1, 1, 1]} : vector<2x8x32xf32> to vector<2x8x8xf32>
    "tpu.trace_start"() <{level = 10 : i32, message = "bqd,bkd->bqk"}> : () -> ()
    %cst_83 = arith.constant dense<0.000000e+00> : vector<2x8x8xf32>
    %199 = tpu.matmul %196, %197, %cst_83 {dimension_numbers = #tpu.dot_dimension_numbers<[2], [2], [1], [1], [0, 0, 0, 1, 1, 1], [0], [0]>} : vector<2x8x8xf32>, vector<2x8x8xf32>, vector<2x8x8xf32> -> vector<2x8x8xf32>
    "tpu.trace_stop"() : () -> ()
    %cst_84 = arith.constant 0.353553385 : f32
    %200 = vector.broadcast %cst_84 : f32 to vector<2x8x8xf32>
    %201 = arith.mulf %199, %200 : vector<2x8x8xf32>
    %202 = vector.shape_cast %5 : vector<8x8xf32> to vector<1x8x8xf32>
    %203 = vector.broadcast %202 : vector<1x8x8xf32> to vector<2x8x8xf32>
    %204 = arith.addf %201, %203 : vector<2x8x8xf32>
    %cst_85 = arith.constant dense<0xFF800000> : vector<2x8xf32>
    %205 = vector.multi_reduction <maximumf>, %204, %cst_85 [2] : vector<2x8x8xf32> to vector<2x8xf32>
    %206 = vector.shape_cast %205 : vector<2x8xf32> to vector<2x8x1xf32>
    %207 = vector.broadcast %206 : vector<2x8x1xf32> to vector<2x8x8xf32>
    %208 = arith.subf %204, %207 : vector<2x8x8xf32>
    %209 = math.exp %208 : vector<2x8x8xf32>
    %cst_86 = arith.constant dense<0.000000e+00> : vector<2x8xf32>
    %210 = vector.multi_reduction <add>, %209, %cst_86 [2] : vector<2x8x8xf32> to vector<2x8xf32>
    %211 = vector.shape_cast %210 : vector<2x8xf32> to vector<2x8x1xf32>
    %212 = tpu.reciprocal %211 {approx = true} : vector<2x8x1xf32> -> vector<2x8x1xf32>
    %213 = vector.broadcast %212 : vector<2x8x1xf32> to vector<2x8x8xf32>
    %214 = arith.mulf %209, %213 : vector<2x8x8xf32>
    "tpu.trace_start"() <{level = 10 : i32, message = "bqk,bkd->bqd"}> : () -> ()
    %cst_87 = arith.constant dense<0.000000e+00> : vector<2x8x8xf32>
    %215 = tpu.matmul %214, %198, %cst_87 {dimension_numbers = #tpu.dot_dimension_numbers<[2], [1], [1], [2], [0, 0, 0, 1, 1, 2], [0], [0]>} : vector<2x8x8xf32>, vector<2x8x8xf32>, vector<2x8x8xf32> -> vector<2x8x8xf32>
    "tpu.trace_stop"() : () -> ()
    %216 = vector.extract_strided_slice %191 {offsets = [0, 0, 8], sizes = [2, 8, 8], strides = [1, 1, 1]} : vector<2x8x32xf32> to vector<2x8x8xf32>
    %217 = vector.extract_strided_slice %193 {offsets = [0, 0, 8], sizes = [2, 8, 8], strides = [1, 1, 1]} : vector<2x8x32xf32> to vector<2x8x8xf32>
    %218 = vector.extract_strided_slice %195 {offsets = [0, 0, 8], sizes = [2, 8, 8], strides = [1, 1, 1]} : vector<2x8x32xf32> to vector<2x8x8xf32>
    "tpu.trace_start"() <{level = 10 : i32, message = "bqd,bkd->bqk"}> : () -> ()
    %cst_88 = arith.constant dense<0.000000e+00> : vector<2x8x8xf32>
    %219 = tpu.matmul %216, %217, %cst_88 {dimension_numbers = #tpu.dot_dimension_numbers<[2], [2], [1], [1], [0, 0, 0, 1, 1, 1], [0], [0]>} : vector<2x8x8xf32>, vector<2x8x8xf32>, vector<2x8x8xf32> -> vector<2x8x8xf32>
    "tpu.trace_stop"() : () -> ()
    %cst_89 = arith.constant 0.353553385 : f32
    %220 = vector.broadcast %cst_89 : f32 to vector<2x8x8xf32>
    %221 = arith.mulf %219, %220 : vector<2x8x8xf32>
    %222 = vector.shape_cast %5 : vector<8x8xf32> to vector<1x8x8xf32>
    %223 = vector.broadcast %222 : vector<1x8x8xf32> to vector<2x8x8xf32>
    %224 = arith.addf %221, %223 : vector<2x8x8xf32>
    %cst_90 = arith.constant dense<0xFF800000> : vector<2x8xf32>
    %225 = vector.multi_reduction <maximumf>, %224, %cst_90 [2] : vector<2x8x8xf32> to vector<2x8xf32>
    %226 = vector.shape_cast %225 : vector<2x8xf32> to vector<2x8x1xf32>
    %227 = vector.broadcast %226 : vector<2x8x1xf32> to vector<2x8x8xf32>
    %228 = arith.subf %224, %227 : vector<2x8x8xf32>
    %229 = math.exp %228 : vector<2x8x8xf32>
    %cst_91 = arith.constant dense<0.000000e+00> : vector<2x8xf32>
    %230 = vector.multi_reduction <add>, %229, %cst_91 [2] : vector<2x8x8xf32> to vector<2x8xf32>
    %231 = vector.shape_cast %230 : vector<2x8xf32> to vector<2x8x1xf32>
    %232 = tpu.reciprocal %231 {approx = true} : vector<2x8x1xf32> -> vector<2x8x1xf32>
    %233 = vector.broadcast %232 : vector<2x8x1xf32> to vector<2x8x8xf32>
    %234 = arith.mulf %229, %233 : vector<2x8x8xf32>
    "tpu.trace_start"() <{level = 10 : i32, message = "bqk,bkd->bqd"}> : () -> ()
    %cst_92 = arith.constant dense<0.000000e+00> : vector<2x8x8xf32>
    %235 = tpu.matmul %234, %218, %cst_92 {dimension_numbers = #tpu.dot_dimension_numbers<[2], [1], [1], [2], [0, 0, 0, 1, 1, 2], [0], [0]>} : vector<2x8x8xf32>, vector<2x8x8xf32>, vector<2x8x8xf32> -> vector<2x8x8xf32>
    "tpu.trace_stop"() : () -> ()
    %236 = vector.extract_strided_slice %191 {offsets = [0, 0, 16], sizes = [2, 8, 8], strides = [1, 1, 1]} : vector<2x8x32xf32> to vector<2x8x8xf32>
    %237 = vector.extract_strided_slice %193 {offsets = [0, 0, 16], sizes = [2, 8, 8], strides = [1, 1, 1]} : vector<2x8x32xf32> to vector<2x8x8xf32>
    %238 = vector.extract_strided_slice %195 {offsets = [0, 0, 16], sizes = [2, 8, 8], strides = [1, 1, 1]} : vector<2x8x32xf32> to vector<2x8x8xf32>
    "tpu.trace_start"() <{level = 10 : i32, message = "bqd,bkd->bqk"}> : () -> ()
    %cst_93 = arith.constant dense<0.000000e+00> : vector<2x8x8xf32>
    %239 = tpu.matmul %236, %237, %cst_93 {dimension_numbers = #tpu.dot_dimension_numbers<[2], [2], [1], [1], [0, 0, 0, 1, 1, 1], [0], [0]>} : vector<2x8x8xf32>, vector<2x8x8xf32>, vector<2x8x8xf32> -> vector<2x8x8xf32>
    "tpu.trace_stop"() : () -> ()
    %cst_94 = arith.constant 0.353553385 : f32
    %240 = vector.broadcast %cst_94 : f32 to vector<2x8x8xf32>
    %241 = arith.mulf %239, %240 : vector<2x8x8xf32>
    %242 = vector.shape_cast %5 : vector<8x8xf32> to vector<1x8x8xf32>
    %243 = vector.broadcast %242 : vector<1x8x8xf32> to vector<2x8x8xf32>
    %244 = arith.addf %241, %243 : vector<2x8x8xf32>
    %cst_95 = arith.constant dense<0xFF800000> : vector<2x8xf32>
    %245 = vector.multi_reduction <maximumf>, %244, %cst_95 [2] : vector<2x8x8xf32> to vector<2x8xf32>
    %246 = vector.shape_cast %245 : vector<2x8xf32> to vector<2x8x1xf32>
    %247 = vector.broadcast %246 : vector<2x8x1xf32> to vector<2x8x8xf32>
    %248 = arith.subf %244, %247 : vector<2x8x8xf32>
    %249 = math.exp %248 : vector<2x8x8xf32>
    %cst_96 = arith.constant dense<0.000000e+00> : vector<2x8xf32>
    %250 = vector.multi_reduction <add>, %249, %cst_96 [2] : vector<2x8x8xf32> to vector<2x8xf32>
    %251 = vector.shape_cast %250 : vector<2x8xf32> to vector<2x8x1xf32>
    %252 = tpu.reciprocal %251 {approx = true} : vector<2x8x1xf32> -> vector<2x8x1xf32>
    %253 = vector.broadcast %252 : vector<2x8x1xf32> to vector<2x8x8xf32>
    %254 = arith.mulf %249, %253 : vector<2x8x8xf32>
    "tpu.trace_start"() <{level = 10 : i32, message = "bqk,bkd->bqd"}> : () -> ()
    %cst_97 = arith.constant dense<0.000000e+00> : vector<2x8x8xf32>
    %255 = tpu.matmul %254, %238, %cst_97 {dimension_numbers = #tpu.dot_dimension_numbers<[2], [1], [1], [2], [0, 0, 0, 1, 1, 2], [0], [0]>} : vector<2x8x8xf32>, vector<2x8x8xf32>, vector<2x8x8xf32> -> vector<2x8x8xf32>
    "tpu.trace_stop"() : () -> ()
    %256 = vector.extract_strided_slice %191 {offsets = [0, 0, 24], sizes = [2, 8, 8], strides = [1, 1, 1]} : vector<2x8x32xf32> to vector<2x8x8xf32>
    %257 = vector.extract_strided_slice %193 {offsets = [0, 0, 24], sizes = [2, 8, 8], strides = [1, 1, 1]} : vector<2x8x32xf32> to vector<2x8x8xf32>
    %258 = vector.extract_strided_slice %195 {offsets = [0, 0, 24], sizes = [2, 8, 8], strides = [1, 1, 1]} : vector<2x8x32xf32> to vector<2x8x8xf32>
    "tpu.trace_start"() <{level = 10 : i32, message = "bqd,bkd->bqk"}> : () -> ()
    %cst_98 = arith.constant dense<0.000000e+00> : vector<2x8x8xf32>
    %259 = tpu.matmul %256, %257, %cst_98 {dimension_numbers = #tpu.dot_dimension_numbers<[2], [2], [1], [1], [0, 0, 0, 1, 1, 1], [0], [0]>} : vector<2x8x8xf32>, vector<2x8x8xf32>, vector<2x8x8xf32> -> vector<2x8x8xf32>
    "tpu.trace_stop"() : () -> ()
    %cst_99 = arith.constant 0.353553385 : f32
    %260 = vector.broadcast %cst_99 : f32 to vector<2x8x8xf32>
    %261 = arith.mulf %259, %260 : vector<2x8x8xf32>
    %262 = vector.shape_cast %5 : vector<8x8xf32> to vector<1x8x8xf32>
    %263 = vector.broadcast %262 : vector<1x8x8xf32> to vector<2x8x8xf32>
    %264 = arith.addf %261, %263 : vector<2x8x8xf32>
    %cst_100 = arith.constant dense<0xFF800000> : vector<2x8xf32>
    %265 = vector.multi_reduction <maximumf>, %264, %cst_100 [2] : vector<2x8x8xf32> to vector<2x8xf32>
    %266 = vector.shape_cast %265 : vector<2x8xf32> to vector<2x8x1xf32>
    %267 = vector.broadcast %266 : vector<2x8x1xf32> to vector<2x8x8xf32>
    %268 = arith.subf %264, %267 : vector<2x8x8xf32>
    %269 = math.exp %268 : vector<2x8x8xf32>
    %cst_101 = arith.constant dense<0.000000e+00> : vector<2x8xf32>
    %270 = vector.multi_reduction <add>, %269, %cst_101 [2] : vector<2x8x8xf32> to vector<2x8xf32>
    %271 = vector.shape_cast %270 : vector<2x8xf32> to vector<2x8x1xf32>
    %272 = tpu.reciprocal %271 {approx = true} : vector<2x8x1xf32> -> vector<2x8x1xf32>
    %273 = vector.broadcast %272 : vector<2x8x1xf32> to vector<2x8x8xf32>
    %274 = arith.mulf %269, %273 : vector<2x8x8xf32>
    "tpu.trace_start"() <{level = 10 : i32, message = "bqk,bkd->bqd"}> : () -> ()
    %cst_102 = arith.constant dense<0.000000e+00> : vector<2x8x8xf32>
    %275 = tpu.matmul %274, %258, %cst_102 {dimension_numbers = #tpu.dot_dimension_numbers<[2], [1], [1], [2], [0, 0, 0, 1, 1, 2], [0], [0]>} : vector<2x8x8xf32>, vector<2x8x8xf32>, vector<2x8x8xf32> -> vector<2x8x8xf32>
    "tpu.trace_stop"() : () -> ()
    %276 = tpu.concatenate %215, %235, %255, %275 in 2 : vector<2x8x8xf32>, vector<2x8x8xf32>, vector<2x8x8xf32>, vector<2x8x8xf32> -> vector<2x8x32xf32>
    %277 = vector.shape_cast %276 : vector<2x8x32xf32> to vector<16x32xf32>
    %c1_103 = arith.constant 1 : index
    %c0_104 = arith.constant 0 : index
    %c0_105 = arith.constant 0 : index
    %278 = vector.load %arg4[%c1_103, %c0_104, %c0_105] : memref<2x32x32xf32, #tpu.memory_space<vmem>>, vector<1x32x32xf32>
    %279 = vector.shape_cast %278 : vector<1x32x32xf32> to vector<32x32xf32>
    %cst_106 = arith.constant dense<0.000000e+00> : vector<16x32xf32>
    %280 = tpu.matmul %277, %279, %cst_106 {dimension_numbers = #tpu.dot_dimension_numbers<[1], [0], [0], [1], [0, 0, 1, 1], [], []>} : vector<16x32xf32>, vector<32x32xf32>, vector<16x32xf32> -> vector<16x32xf32>
    %c1_107 = arith.constant 1 : index
    %c0_108 = arith.constant 0 : index
    %c0_109 = arith.constant 0 : index
    %281 = vector.load %arg5[%c1_107, %c0_108, %c0_109] : memref<2x1x32xf32, #tpu.memory_space<vmem>>, vector<1x1x32xf32>
    %282 = vector.shape_cast %281 : vector<1x1x32xf32> to vector<1x32xf32>
    %283 = vector.broadcast %282 : vector<1x32xf32> to vector<16x32xf32>
    %284 = arith.addf %280, %283 : vector<16x32xf32>
    %285 = arith.addf %182, %284 : vector<16x32xf32>
    %c1_110 = arith.constant 1 : index
    %c0_111 = arith.constant 0 : index
    %c0_112 = arith.constant 0 : index
    %286 = vector.load %arg10[%c1_110, %c0_111, %c0_112] : memref<2x1x32xf32, #tpu.memory_space<vmem>>, vector<1x1x32xf32>
    %287 = vector.shape_cast %286 : vector<1x1x32xf32> to vector<1x32xf32>
    %c1_113 = arith.constant 1 : index
    %c0_114 = arith.constant 0 : index
    %c0_115 = arith.constant 0 : index
    %288 = vector.load %arg11[%c1_113, %c0_114, %c0_115] : memref<2x1x32xf32, #tpu.memory_space<vmem>>, vector<1x1x32xf32>
    %289 = vector.shape_cast %288 : vector<1x1x32xf32> to vector<1x32xf32>
    %cst_116 = arith.constant dense<0.000000e+00> : vector<16xf32>
    %290 = vector.multi_reduction <add>, %285, %cst_116 [1] : vector<16x32xf32> to vector<16xf32>
    %291 = vector.shape_cast %290 : vector<16xf32> to vector<16x1xf32>
    %cst_117 = arith.constant 3.200000e+01 : f32
    %292 = vector.broadcast %cst_117 : f32 to vector<16x1xf32>
    %293 = arith.divf %291, %292 : vector<16x1xf32>
    %294 = vector.broadcast %293 : vector<16x1xf32> to vector<16x32xf32>
    %295 = arith.subf %285, %294 : vector<16x32xf32>
    %296 = arith.mulf %295, %295 : vector<16x32xf32>
    %cst_118 = arith.constant dense<0.000000e+00> : vector<16xf32>
    %297 = vector.multi_reduction <add>, %296, %cst_118 [1] : vector<16x32xf32> to vector<16xf32>
    %298 = vector.shape_cast %297 : vector<16xf32> to vector<16x1xf32>
    %cst_119 = arith.constant 3.200000e+01 : f32
    %299 = vector.broadcast %cst_119 : f32 to vector<16x1xf32>
    %300 = arith.divf %298, %299 : vector<16x1xf32>
    %301 = vector.broadcast %293 : vector<16x1xf32> to vector<16x32xf32>
    %302 = arith.subf %285, %301 : vector<16x32xf32>
    %cst_120 = arith.constant 9.99999974E-6 : f32
    %303 = vector.broadcast %cst_120 : f32 to vector<16x1xf32>
    %304 = arith.addf %300, %303 : vector<16x1xf32>
    %305 = math.rsqrt %304 : vector<16x1xf32>
    %306 = vector.broadcast %305 : vector<16x1xf32> to vector<16x32xf32>
    %307 = arith.mulf %302, %306 : vector<16x32xf32>
    %308 = vector.broadcast %287 : vector<1x32xf32> to vector<16x32xf32>
    %309 = arith.mulf %307, %308 : vector<16x32xf32>
    %310 = vector.broadcast %289 : vector<1x32xf32> to vector<16x32xf32>
    %311 = arith.addf %309, %310 : vector<16x32xf32>
    %c1_121 = arith.constant 1 : index
    %c0_122 = arith.constant 0 : index
    %c0_123 = arith.constant 0 : index
    %312 = vector.load %arg6[%c1_121, %c0_122, %c0_123] : memref<2x32x256xf32, #tpu.memory_space<vmem>>, vector<1x32x256xf32>
    %313 = vector.shape_cast %312 : vector<1x32x256xf32> to vector<32x256xf32>
    %cst_124 = arith.constant dense<0.000000e+00> : vector<16x256xf32>
    %314 = tpu.matmul %311, %313, %cst_124 {dimension_numbers = #tpu.dot_dimension_numbers<[1], [0], [0], [1], [0, 0, 1, 1], [], []>} : vector<16x32xf32>, vector<32x256xf32>, vector<16x256xf32> -> vector<16x256xf32>
    %c1_125 = arith.constant 1 : index
    %c0_126 = arith.constant 0 : index
    %c0_127 = arith.constant 0 : index
    %315 = vector.load %arg7[%c1_125, %c0_126, %c0_127] : memref<2x1x256xf32, #tpu.memory_space<vmem>>, vector<1x1x256xf32>
    %316 = vector.shape_cast %315 : vector<1x1x256xf32> to vector<1x256xf32>
    %317 = vector.broadcast %316 : vector<1x256xf32> to vector<16x256xf32>
    %318 = arith.addf %314, %317 : vector<16x256xf32>
    %cst_128 = arith.constant 0.000000e+00 : f32
    %319 = vector.broadcast %cst_128 : f32 to vector<16x256xf32>
    %320 = arith.maximumf %318, %319 : vector<16x256xf32>
    %c1_129 = arith.constant 1 : index
    %c0_130 = arith.constant 0 : index
    %c0_131 = arith.constant 0 : index
    %321 = vector.load %arg8[%c1_129, %c0_130, %c0_131] : memref<2x256x32xf32, #tpu.memory_space<vmem>>, vector<1x256x32xf32>
    %322 = vector.shape_cast %321 : vector<1x256x32xf32> to vector<256x32xf32>
    %cst_132 = arith.constant dense<0.000000e+00> : vector<16x32xf32>
    %323 = tpu.matmul %320, %322, %cst_132 {dimension_numbers = #tpu.dot_dimension_numbers<[1], [0], [0], [1], [0, 0, 1, 1], [], []>} : vector<16x256xf32>, vector<256x32xf32>, vector<16x32xf32> -> vector<16x32xf32>
    %c1_133 = arith.constant 1 : index
    %c0_134 = arith.constant 0 : index
    %c0_135 = arith.constant 0 : index
    %324 = vector.load %arg9[%c1_133, %c0_134, %c0_135] : memref<2x1x32xf32, #tpu.memory_space<vmem>>, vector<1x1x32xf32>
    %325 = vector.shape_cast %324 : vector<1x1x32xf32> to vector<1x32xf32>
    %326 = vector.broadcast %325 : vector<1x32xf32> to vector<16x32xf32>
    %327 = arith.addf %323, %326 : vector<16x32xf32>
    %328 = arith.addf %311, %327 : vector<16x32xf32>
    %c1_136 = arith.constant 1 : index
    %c0_137 = arith.constant 0 : index
    %c0_138 = arith.constant 0 : index
    %329 = vector.load %arg12[%c1_136, %c0_137, %c0_138] : memref<2x1x32xf32, #tpu.memory_space<vmem>>, vector<1x1x32xf32>
    %330 = vector.shape_cast %329 : vector<1x1x32xf32> to vector<1x32xf32>
    %c1_139 = arith.constant 1 : index
    %c0_140 = arith.constant 0 : index
    %c0_141 = arith.constant 0 : index
    %331 = vector.load %arg13[%c1_139, %c0_140, %c0_141] : memref<2x1x32xf32, #tpu.memory_space<vmem>>, vector<1x1x32xf32>
    %332 = vector.shape_cast %331 : vector<1x1x32xf32> to vector<1x32xf32>
    %cst_142 = arith.constant dense<0.000000e+00> : vector<16xf32>
    %333 = vector.multi_reduction <add>, %328, %cst_142 [1] : vector<16x32xf32> to vector<16xf32>
    %334 = vector.shape_cast %333 : vector<16xf32> to vector<16x1xf32>
    %cst_143 = arith.constant 3.200000e+01 : f32
    %335 = vector.broadcast %cst_143 : f32 to vector<16x1xf32>
    %336 = arith.divf %334, %335 : vector<16x1xf32>
    %337 = vector.broadcast %336 : vector<16x1xf32> to vector<16x32xf32>
    %338 = arith.subf %328, %337 : vector<16x32xf32>
    %339 = arith.mulf %338, %338 : vector<16x32xf32>
    %cst_144 = arith.constant dense<0.000000e+00> : vector<16xf32>
    %340 = vector.multi_reduction <add>, %339, %cst_144 [1] : vector<16x32xf32> to vector<16xf32>
    %341 = vector.shape_cast %340 : vector<16xf32> to vector<16x1xf32>
    %cst_145 = arith.constant 3.200000e+01 : f32
    %342 = vector.broadcast %cst_145 : f32 to vector<16x1xf32>
    %343 = arith.divf %341, %342 : vector<16x1xf32>
    %344 = vector.broadcast %336 : vector<16x1xf32> to vector<16x32xf32>
    %345 = arith.subf %328, %344 : vector<16x32xf32>
    %cst_146 = arith.constant 9.99999974E-6 : f32
    %346 = vector.broadcast %cst_146 : f32 to vector<16x1xf32>
    %347 = arith.addf %343, %346 : vector<16x1xf32>
    %348 = math.rsqrt %347 : vector<16x1xf32>
    %349 = vector.broadcast %348 : vector<16x1xf32> to vector<16x32xf32>
    %350 = arith.mulf %345, %349 : vector<16x32xf32>
    %351 = vector.broadcast %330 : vector<1x32xf32> to vector<16x32xf32>
    %352 = arith.mulf %350, %351 : vector<16x32xf32>
    %353 = vector.broadcast %332 : vector<1x32xf32> to vector<16x32xf32>
    %354 = arith.addf %352, %353 : vector<16x32xf32>
    %c0_147 = arith.constant 0 : index
    %c0_148 = arith.constant 0 : index
    %355 = vector.load %arg14[%c0_147, %c0_148] : memref<32x16xf32, #tpu.memory_space<vmem>>, vector<32x16xf32>
    %cst_149 = arith.constant dense<0.000000e+00> : vector<16x16xf32>
    %356 = tpu.matmul %354, %355, %cst_149 {dimension_numbers = #tpu.dot_dimension_numbers<[1], [0], [0], [1], [0, 0, 1, 1], [], []>} : vector<16x32xf32>, vector<32x16xf32>, vector<16x16xf32> -> vector<16x16xf32>
    %c0_150 = arith.constant 0 : index
    %c0_151 = arith.constant 0 : index
    %357 = vector.load %arg15[%c0_150, %c0_151] : memref<1x16xf32, #tpu.memory_space<vmem>>, vector<1x16xf32>
    %358 = vector.broadcast %357 : vector<1x16xf32> to vector<16x16xf32>
    %359 = arith.addf %356, %358 : vector<16x16xf32>
    %360 = vector.shape_cast %359 : vector<16x16xf32> to vector<2x8x16xf32>
    %c0_152 = arith.constant 0 : index
    %c0_153 = arith.constant 0 : index
    %c0_154 = arith.constant 0 : index
    %361 = vector.load %arg16[%c0_152, %c0_153, %c0_154] : memref<2x8x16xf32, #tpu.memory_space<vmem>>, vector<2x8x16xf32>
    tpu.vector_store %arg16[%c0_152, %c0_153, %c0_154], %360 {strides = array<i32>} : memref<2x8x16xf32, #tpu.memory_space<vmem>>, vector<2x8x16xf32>,
    return
  }
}

</mosaic_0001>

<bundles_post_ra>
// kernel: embedding_forward.1
= control target key start
LH: loop header
LB: loop body
LE: loop exit
PB: predicated region body
PF: predicated region fallthrough
CT: control target
= control target key end

     0   :  { %vm75_vm0 = vcmask 261120   ;;  %v4636_v11 = vmov 0.0   ;;  %vm4637_vm1 = vmmov 0   ;;  %s4638_s21 = smov 96   ;;  %vm160_vm2 = vcmask 64512   ;;  %s4640_s22 = smov 64   ;;  %s5529_s2 = inlined_call_operand.vmem [shape: f32[2,32,96], index: 2, kind: input, shape index: {}]   ;;  %s5530_s0 = inlined_call_operand.vmem [shape: f32[2,8,32], index: 0, kind: input, shape index: {}]   ;;  %s5531_s1 = inlined_call_operand.vmem [shape: f32[1,8,32], index: 1, kind: input, shape index: {}]   ;;  %s5532_s3 = inlined_call_operand.vmem [shape: f32[2,1,96], index: 3, kind: input, shape index: {}]   ;;  %s5533_s4 = inlined_call_operand.vmem [shape: f32[2,32,32], index: 4, kind: input, shape index: {}]   ;;  %s5534_s5 = inlined_call_operand.vmem [shape: f32[2,1,32], index: 5, kind: input, shape index: {}]   ;;  %s5535_s6 = inlined_call_operand.vmem [shape: f32[2,32,256], index: 6, kind: input, shape index: {}]   ;;  %s5536_s8 = inlined_call_operand.vmem [shape: f32[2,256,32], index: 8, kind: input, shape index: {}]   ;;  %s5537_s10 = inlined_call_operand.vmem [shape: f32[2,1,32], index: 10, kind: input, shape index: {}]   ;;  %s5538_s11 = inlined_call_operand.vmem [shape: f32[2,1,32], index: 11, kind: input, shape index: {}]   ;;  %s5539_s7 = inlined_call_operand.vmem [shape: f32[2,1,256], index: 7, kind: input, shape index: {}]   ;;  %s5540_s9 = inlined_call_operand.vmem [shape: f32[2,1,32], index: 9, kind: input, shape index: {}]   ;;  %s5541_s12 = inlined_call_operand.vmem [shape: f32[2,1,32], index: 12, kind: input, shape index: {}]   ;;  %s5542_s13 = inlined_call_operand.vmem [shape: f32[2,1,32], index: 13, kind: input, shape index: {}]   ;;  %s5543_s14 = inlined_call_operand.vmem [shape: f32[32,16], index: 14, kind: input, shape index: {}]   ;;  %s5544_s15 = inlined_call_operand.vmem [shape: f32[1,16], index: 15, kind: input, shape index: {}]   ;;  %s5545_s16 = inlined_call_operand.vmem [shape: f32[2,8,16], index: 16, kind: output, shape index: {}]  }
   0x1   :  { %5565 = sst [smem:[#allocation2_spill]] %s5529_s2  ;;  %v59_v5 = vld [vmem:[%s5530_s0] sm:$0xff]  ;;  %v60_v9 = vld [vmem:[%s5530_s0 + $0x8] sm:$0xff]  ;;  %4220 = vmatprep.subr.mxu1 %v4636_v11  ;;  %4222 = vmatprep.mubr.msk.f32.mxu1 %vm4637_vm1, %v4636_v11  ;;  %v53_v19 = vlaneseq  ;;  %v4639_v23 = vmov -1e+30   ;;  %s4641_s24 = smov 88  }
   0x2   :  { %s5566_s23 = sld [smem:[#allocation2_spill]]  ;;  %v61_v7 = vld [vmem:[%s5531_s1] sm:$0xff]  ;;  %s4642_s25 = smov 120   ;;  %vm1518_vm4 = vcmask 130048   ;;  %vm1521_vm5 = vcmask 195584  }
   0x3   :  { %v4756_v8 = vadd.f32 %v61_v7, %v59_v5  ;;  %v4763_v10 = vadd.f32 %v61_v7, %v60_v9  ;;  %v3901_v12 = vld [vmem:[%s5532_s3] ss:$0 sm:$0xff]  ;;  %v4796_v20 = vshrl.u32 %v53_v19, 7  ;;  %v56_v21 = vand.u32 127, %v53_v19  ;;  %s4643_s26 = smov 56   ;;  %s5563_s27 = smov 80  }
   0x4   :  { %s5561_s28 = smov 112   ;;  %s5559_s29 = smov 48  }
   0x5   :  { %4212 = vmatprep.mubr.msk.f32.mxu0 %vm75_vm0, %v4756_v8  ;;  %vm57_vm3 = vcmp.le.s32.totalorder %v56_v21, %v4796_v20  ;;  %s5555_s30 = smov 72   ;;  %s5553_s2 = smov 104  }
   0x6   :  { %v4799_v24 = vsel %vm57_vm3, 0.0, %v4639_v23  ;;  %s5551_s17 = smov 40   ;;  %s5549_s18 = smov 8  }
   0x7   :  { %s5547_s19 = smov 16   ;;  %s5557_s20 = smov 24  }
   0x8   :  { %v64_v0 = vld [vmem:[%s5566_s23] sm:$0xff]  ;;  %v65_v1 = vld [vmem:[%s5566_s23 + $0x8] sm:$0xff]  ;;  %v66_v2 = vld [vmem:[%s5566_s23 + $0x10] sm:$0xff]  ;;  %s5573_s1 = smov 8  }
   0x9   :  { %v4419_v3 = vpack.c.bf16 %v65_v1, %v64_v0  ;;  %v67_v4 = vld [vmem:[%s5566_s23 + $0x18] sm:$0xff] }
   0xa   :  { %v4423_v6 = vpack.c.bf16 %v67_v4, %v66_v2 }
   0xb   :  { %4420 = vmatprep.subr.bf16.mxu0 %v4419_v3 }
   0xc   :  { %4422 = vmatpush3.bf16.msra.mxu0 %v4419_v3 }
   0xd   :  { %4424 = vmatprep.subr.bf16.mxu0 %v4423_v6 }
  0x10   :  { %4426 = vmatpush3.bf16.msra.mxu0 %v4423_v6 }
  0x11   :  { %4215 = vmatprep.subr.mxu0 %v4636_v11 }
  0x13   :  { %4213 = vmatmul.mubr.msk.f32.vlgmr.msra.gmra.mrb[0].mxu0 %vm75_vm0, %v4763_v10 }
  0x14   :  { %4217 = vmatprep.mubr.msk.f32.mxu0 %vm4637_vm1, %v4636_v11 }
  0xe6   :  { %v4214_v13 = vpop.f32.mrb[0].mxu0 }
  0xe7   :  { %v148_v14 = vpop.f32.mrb[1].mxu0  ;;  %v4780_v16 = vadd.f32 %v4214_v13, %v3901_v12 }
  0xe8   :  { %v4776_v15 = vadd.f32 %v3901_v12, %v148_v14 }
  0xea   :  { %158 = vrot.lane.b32.xlu0 %v4776_v15, %s4638_s21 }
  0xee   :  { %236 = vrot.lane.b32.xlu0 %v4780_v16, %s4638_s21 }
 0x15c   :  { %v159_v17 = vpop.permute.xlu0 %158 }
 0x15d   :  { %4216 = vmatpush3.xpose.msk.msra.mxu0 %vm160_vm2, %v159_v17 }
 0x15e   :  { %4225 = vmatprep.subr.mxu0 %v4636_v11 }
 0x160   :  { %4218 = vmatmul.mubr.msk.f32.vlgmr.msra.gmra.mrb[2].mxu0 %vm160_vm2, %v4776_v15  ;;  %v237_v18 = vpop.permute.xlu0 %236 }
 0x161   :  { %4221 = vmatpush3.xpose.msk.msra.mxu1 %vm160_vm2, %v237_v18  ;;  %4227 = vmatprep.mubr.msk.f32.mxu0 %vm4637_vm1, %v4636_v11 }
 0x162   :  { %4230 = vmatprep.subr.mxu1 %v4636_v11 }
 0x164   :  { %4223 = vmatmul.mubr.msk.f32.vlgmr.msra.gmra.mrb[0].mxu1 %vm160_vm2, %v4780_v16 }
 0x165   :  { %4232 = vmatprep.mubr.msk.f32.mxu1 %vm4637_vm1, %v4636_v11 }
 0x233   :  { %v231_v22 = vpop.f32.mrb[2].mxu0 }
 0x234   :  { %v312_v25 = vmul.f32 0.35355338, %v231_v22  ;;  %v4219_v26 = vpop.f32.mrb[3].mxu0 }
 0x236   :  { %v314_v27 = vadd.f32 %v312_v25, %v4799_v24 }
 0x237   :  { %v308_v28 = vpop.f32.mrb[0].mxu1 }
 0x238   :  { %v313_v29 = vmul.f32 0.35355338, %v308_v28  ;;  %v4224_v30 = vpop.f32.mrb[1].mxu1  ;;  %v316_v31 = vsel %vm160_vm2, %v314_v27, -inf }
 0x239   :  { %317 = vmax.xlane.f32.xlu1 %v316_v31 }
 0x23a   :  { %v315_v32 = vadd.f32 %v313_v29, %v4799_v24 }
 0x23c   :  { %v319_v33 = vsel %vm160_vm2, %v315_v32, -inf }
 0x23d   :  { %320 = vmax.xlane.f32.xlu1 %v319_v33 }
 0x24e   :  { %338 = vrot.lane.b32.xlu1 %v4776_v15, %s4640_s22 }
 0x252   :  { %414 = vrot.lane.b32.xlu1 %v4780_v16, %s4640_s22 }
 0x256   :  { %492 = vrot.lane.b32.xlu1 %v4776_v15, %s4641_s24 }
 0x25a   :  { %570 = vrot.lane.b32.xlu1 %v4780_v16, %s4641_s24 }
 0x2c6   :  { %v318_v34 = vpop.xlane.xlu1 %317 }
 0x2c7   :  { %v322_v35 = vsub.f32 %v314_v27, %v318_v34 }
 0x2c9   :  { %v324_v36 = vmul.f32 1.442695, %v322_v35 }
 0x2ca   :  { %v321_v37 = vpop.xlane.xlu1 %320 }
 0x2cb   :  { %4556 = vpow2.f32 %v324_v36  ;;  %v323_v38 = vsub.f32 %v315_v32, %v321_v37 }
 0x2cd   :  { %v326_v39 = vmul.f32 1.442695, %v323_v38 }
 0x2ce   :  { %v339_v40 = vpop.permute.xlu1 %338 }
 0x2cf   :  { %4558 = vpow2.f32 %v326_v39  ;;  %4226 = vmatpush3.msra.mxu0 %v339_v40 }
 0x2d0   :  { %4235 = vmatprep.subr.mxu0 %v4636_v11 }
 0x2d2   :  { %v415_v41 = vpop.permute.xlu1 %414 }
 0x2d3   :  { %4231 = vmatpush3.msra.mxu1 %v415_v41 }
 0x2d4   :  { %4240 = vmatprep.subr.mxu1 %v4636_v11 }
 0x2d5   :  { %v4557_v42 = vpop.eup %4556 }
 0x2d6   :  { %v328_v43 = vsel %vm160_vm2, %v4557_v42, 0.0  ;;  %v493_v46 = vpop.permute.xlu1 %492 }
 0x2d7   :  { %329 = vadd.xlane.f32.xlu0 %v328_v43 }
 0x2d9   :  { %v4559_v44 = vpop.eup %4558 }
 0x2da   :  { %v331_v45 = vsel %vm160_vm2, %v4559_v44, 0.0  ;;  %v571_v47 = vpop.permute.xlu1 %570 }
 0x2db   :  { %332 = vadd.xlane.f32.xlu1 %v331_v45 }
 0x2ec   :  { %568 = vrot.lane.b32.xlu1 %v4780_v16, %s4642_s25 }
 0x2ed   :  { %490 = vrot.lane.b32.xlu0 %v4776_v15, %s4642_s25 }
 0x364   :  { %v330_v48 = vpop.xlane.xlu0 %329 }
 0x365   :  { %4560 = vrcp.f32 %v330_v48 }
 0x368   :  { %v333_v49 = vpop.xlane.xlu1 %332  ;;  %v491_v54 = vpop.permute.xlu0 %490 }
 0x369   :  { %4562 = vrcp.f32 %v333_v49 }
 0x36c   :  { %v569_v55 = vpop.permute.xlu1 %568 }
 0x36f   :  { %v4561_v50 = vpop.eup %4560 }
 0x370   :  { %v336_v51 = vmul.f32 %v4561_v50, %v4557_v42 }
 0x372   :  { %4228 = vmatmul.mubr.msk.f32.vlgmr.msra.gmra.mrb[4].mxu0 %vm160_vm2, %v336_v51 }
 0x373   :  { %v4563_v52 = vpop.eup %4562  ;;  %4236 = vmatpush3.xpose.msk.msra.mxu0 %vm160_vm2, %v493_v46  ;;  %4237 = vmatprep.mubr.msk.f32.mxu0 %vm4637_vm1, %v4636_v11 }
 0x374   :  { %v337_v53 = vmul.f32 %v4563_v52, %v4559_v44  ;;  %4245 = vmatprep.subr.mxu0 %v4636_v11 }
 0x376   :  { %4233 = vmatmul.mubr.msk.f32.vlgmr.msra.gmra.mrb[2].mxu1 %vm160_vm2, %v337_v53  ;;  %4238 = vmatmul.mubr.msk.f32.vlgmr.msra.gmra.mrb[6].mxu0 %vm160_vm2, %v491_v54 }
 0x377   :  { %4241 = vmatpush3.xpose.msk.msra.mxu1 %vm160_vm2, %v571_v47  ;;  %4242 = vmatprep.mubr.msk.f32.mxu1 %vm4637_vm1, %v4636_v11 }
 0x378   :  { %4250 = vmatprep.subr.mxu1 %v4636_v11  ;;  %4247 = vmatprep.mubr.msk.f32.mxu0 %vm4637_vm1, %v4636_v11 }
 0x37a   :  { %4243 = vmatmul.mubr.msk.f32.vlgmr.msra.gmra.mrb[4].mxu1 %vm160_vm2, %v569_v55 }
 0x37b   :  { %4252 = vmatprep.mubr.msk.f32.mxu1 %vm4637_vm1, %v4636_v11 }
 0x445   :  { %v4837_v56 = vpop.f32.mrb[4].mxu0 }
 0x446   :  { %v4229_v57 = vpop.f32.mrb[5].mxu0 }
 0x449   :  { %v4839_v58 = vpop.f32.mrb[2].mxu1  ;;  %v564_v59 = vpop.f32.mrb[6].mxu0 }
 0x44a   :  { %v646_v60 = vmul.f32 0.35355338, %v564_v59  ;;  %v4234_v61 = vpop.f32.mrb[3].mxu1  ;;  %v4239_v62 = vpop.f32.mrb[7].mxu0 }
 0x44c   :  { %v648_v63 = vadd.f32 %v646_v60, %v4799_v24 }
 0x44d   :  { %v642_v0 = vpop.f32.mrb[4].mxu1 }
 0x44e   :  { %v647_v1 = vmul.f32 0.35355338, %v642_v0  ;;  %v4244_v2 = vpop.f32.mrb[5].mxu1  ;;  %v650_v3 = vsel %vm160_vm2, %v648_v63, -inf }
 0x44f   :  { %651 = vmax.xlane.f32.xlu1 %v650_v3 }
 0x450   :  { %v649_v4 = vadd.f32 %v647_v1, %v4799_v24 }
 0x452   :  { %v653_v5 = vsel %vm160_vm2, %v649_v4, -inf }
 0x453   :  { %654 = vmax.xlane.f32.xlu0 %v653_v5 }
 0x460   :  { %672 = vrot.lane.b32.xlu1 %v4776_v15, %s4643_s26 }
 0x464   :  { %826 = vrot.lane.b32.xlu1 %v4776_v15, %s5563_s27 }
 0x468   :  { %904 = vrot.lane.b32.xlu1 %v4780_v16, %s5563_s27 }
 0x469   :  { %748 = vrot.lane.b32.xlu0 %v4780_v16, %s4643_s26 }
 0x46d   :  { %824 = vrot.lane.b32.xlu0 %v4776_v15, %s5561_s28 }
 0x4dc   :  { %v652_v6 = vpop.xlane.xlu1 %651 }
 0x4dd   :  { %v656_v7 = vsub.f32 %v648_v63, %v652_v6 }
 0x4df   :  { %v658_v14 = vmul.f32 1.442695, %v656_v7 }
 0x4e0   :  { %v673_v9 = vpop.permute.xlu1 %672  ;;  %v655_v12 = vpop.xlane.xlu0 %654 }
 0x4e1   :  { %v657_v13 = vsub.f32 %v649_v4, %v655_v12  ;;  %4246 = vmatpush3.msra.mxu0 %v673_v9 }
 0x4e2   :  { %4255 = vmatprep.subr.mxu0 %v4636_v11 }
 0x4e3   :  { %v660_v17 = vmul.f32 1.442695, %v657_v13 }
 0x4e4   :  { %v749_v18 = vpop.permute.xlu0 %748  ;;  %v827_v25 = vpop.permute.xlu1 %826 }
 0x4e5   :  { %4564 = vpow2.f32 %v660_v17  ;;  %4251 = vmatpush3.msra.mxu1 %v749_v18 }
 0x4e6   :  { %4260 = vmatprep.subr.mxu1 %v4636_v11  ;;  %4566 = vpow2.f32 %v658_v14 }
 0x4e8   :  { %v905_v26 = vpop.permute.xlu1 %904  ;;  %v825_v34 = vpop.permute.xlu0 %824 }
 0x4ef   :  { %v4565_v19 = vpop.eup %4564 }
 0x4f0   :  { %v665_v21 = vsel %vm160_vm2, %v4565_v19, 0.0  ;;  %v4567_v22 = vpop.eup %4566 }
 0x4f1   :  { %666 = vadd.xlane.f32.xlu1 %v665_v21  ;;  %v662_v23 = vsel %vm160_vm2, %v4567_v22, 0.0 }
 0x4f5   :  { %663 = vadd.xlane.f32.xlu1 %v662_v23 }
 0x506   :  { %902 = vrot.lane.b32.xlu1 %v4780_v16, %s5561_s28 }
 0x57e   :  { %v667_v27 = vpop.xlane.xlu1 %666 }
 0x57f   :  { %4568 = vrcp.f32 %v667_v27 }
 0x582   :  { %v664_v28 = vpop.xlane.xlu1 %663 }
 0x583   :  { %4570 = vrcp.f32 %v664_v28 }
 0x586   :  { %v903_v33 = vpop.permute.xlu1 %902 }
 0x589   :  { %v4569_v29 = vpop.eup %4568 }
 0x58a   :  { %v671_v30 = vmul.f32 %v4569_v29, %v4565_v19 }
 0x58c   :  { %4253 = vmatmul.mubr.msk.f32.vlgmr.msra.gmra.mrb[6].mxu1 %vm160_vm2, %v671_v30 }
 0x58d   :  { %v4571_v31 = vpop.eup %4570  ;;  %4261 = vmatpush3.xpose.msk.msra.mxu1 %vm160_vm2, %v905_v26  ;;  %4262 = vmatprep.mubr.msk.f32.mxu1 %vm4637_vm1, %v4636_v11 }
 0x58e   :  { %v670_v32 = vmul.f32 %v4571_v31, %v4567_v22  ;;  %4270 = vmatprep.subr.mxu1 %v4636_v11 }
 0x590   :  { %4248 = vmatmul.mubr.msk.f32.vlgmr.msra.gmra.mrb[8].mxu0 %vm160_vm2, %v670_v32  ;;  %4263 = vmatmul.mubr.msk.f32.vlgmr.msra.gmra.mrb[8].mxu1 %vm160_vm2, %v903_v33 }
 0x591   :  { %4256 = vmatpush3.xpose.msk.msra.mxu0 %vm160_vm2, %v827_v25  ;;  %4257 = vmatprep.mubr.msk.f32.mxu0 %vm4637_vm1, %v4636_v11 }
 0x592   :  { %4265 = vmatprep.subr.mxu0 %v4636_v11  ;;  %4272 = vmatprep.mubr.msk.f32.mxu1 %vm4637_vm1, %v4636_v11 }
 0x594   :  { %4258 = vmatmul.mubr.msk.f32.vlgmr.msra.gmra.mrb[10].mxu0 %vm160_vm2, %v825_v34 }
 0x595   :  { %4267 = vmatprep.mubr.msk.f32.mxu0 %vm4637_vm1, %v4636_v11 }
 0x65f   :  { %v4877_v35 = vpop.f32.mrb[6].mxu1 }
 0x660   :  { %v4254_v36 = vpop.f32.mrb[7].mxu1 }
 0x663   :  { %v4879_v37 = vpop.f32.mrb[8].mxu0  ;;  %v976_v38 = vpop.f32.mrb[8].mxu1 }
 0x664   :  { %v981_v39 = vmul.f32 0.35355338, %v976_v38  ;;  %v4249_v40 = vpop.f32.mrb[9].mxu0  ;;  %v4264_v41 = vpop.f32.mrb[9].mxu1 }
 0x666   :  { %v983_v42 = vadd.f32 %v981_v39, %v4799_v24 }
 0x667   :  { %v898_v43 = vpop.f32.mrb[10].mxu0 }
 0x668   :  { %v980_v44 = vmul.f32 0.35355338, %v898_v43  ;;  %v4259_v45 = vpop.f32.mrb[11].mxu0  ;;  %v987_v46 = vsel %vm160_vm2, %v983_v42, -inf }
 0x669   :  { %988 = vmax.xlane.f32.xlu1 %v987_v46 }
 0x66a   :  { %v982_v47 = vadd.f32 %v980_v44, %v4799_v24 }
 0x66c   :  { %v984_v48 = vsel %vm160_vm2, %v982_v47, -inf }
 0x66d   :  { %985 = vmax.xlane.f32.xlu0 %v984_v48 }
 0x67a   :  { %1006 = vrot.lane.b32.xlu1 %v4776_v15, %s5559_s29 }
 0x67e   :  { %1160 = vrot.lane.b32.xlu1 %v4776_v15, %s5555_s30 }
 0x682   :  { %1238 = vrot.lane.b32.xlu1 %v4780_v16, %s5555_s30  ;;  %s5574_s30 = smov 16  }
 0x683   :  { %1082 = vrot.lane.b32.xlu0 %v4780_v16, %s5559_s29 }
 0x686   :  { %1236 = vrot.lane.b32.xlu1 %v4780_v16, %s5553_s2 }
 0x6f6   :  { %v989_v49 = vpop.xlane.xlu1 %988 }
 0x6f7   :  { %v991_v50 = vsub.f32 %v983_v42, %v989_v49  ;;  %v1526_v49 = vld [vmem:[%s5533_s4 + $0x10] sm:$0xff] }
 0x6f9   :  { %v994_v51 = vmul.f32 1.442695, %v991_v50  ;;  %v1527_v50 = vld [vmem:[%s5533_s4 + $0x18] sm:$0xff] }
 0x6fa   :  { %v1007_v52 = vpop.permute.xlu1 %1006  ;;  %v986_v53 = vpop.xlane.xlu0 %985 }
 0x6fb   :  { %4572 = vpow2.f32 %v994_v51  ;;  %v990_v54 = vsub.f32 %v982_v47, %v986_v53  ;;  %4266 = vmatpush3.msra.mxu0 %v1007_v52  ;;  %v1525_v47 = vld [vmem:[%s5533_s4 + $0x8] sm:$0xff]  ;;  %v4431_v51 = vpack.c.bf16 %v1527_v50, %v1526_v49  ;;  %v1770_v50 = vld [vmem:[%s5536_s8] sm:$0xff] }
 0x6fc   :  { %4275 = vmatprep.subr.mxu0 %v4636_v11 }
 0x6fd   :  { %v992_v55 = vmul.f32 1.442695, %v990_v54 }
 0x6fe   :  { %v1083_v57 = vpop.permute.xlu0 %1082  ;;  %v1161_v1 = vpop.permute.xlu1 %1160 }
 0x6ff   :  { %4574 = vpow2.f32 %v992_v55  ;;  %4271 = vmatpush3.msra.mxu1 %v1083_v57 }
 0x700   :  { %4280 = vmatprep.subr.mxu1 %v4636_v11 }
 0x702   :  { %v1239_v3 = vpop.permute.xlu1 %1238 }
 0x705   :  { %v4573_v59 = vpop.eup %4572 }
 0x706   :  { %v999_v60 = vsel %vm160_vm2, %v4573_v59, 0.0  ;;  %v1237_v7 = vpop.permute.xlu1 %1236 }
 0x707   :  { %1000 = vadd.xlane.f32.xlu0 %v999_v60 }
 0x709   :  { %v4575_v61 = vpop.eup %4574 }
 0x70a   :  { %v996_v62 = vsel %vm160_vm2, %v4575_v61, 0.0 }
 0x70b   :  { %997 = vadd.xlane.f32.xlu0 %v996_v62 }
 0x721   :  { %1158 = vrot.lane.b32.xlu0 %v4776_v15, %s5553_s2 }
 0x794   :  { %v1001_v63 = vpop.xlane.xlu0 %1000 }
 0x795   :  { %4576 = vrcp.f32 %v1001_v63 }
 0x798   :  { %v998_v0 = vpop.xlane.xlu0 %997 }
 0x799   :  { %4578 = vrcp.f32 %v998_v0 }
 0x79c   :  { %v1159_v9 = vpop.permute.xlu0 %1158 }
 0x79f   :  { %v4577_v2 = vpop.eup %4576 }
 0x7a0   :  { %v1005_v4 = vmul.f32 %v4577_v2, %v4573_v59 }
 0x7a2   :  { %4273 = vmatmul.mubr.msk.f32.vlgmr.msra.gmra.mrb[10].mxu1 %vm160_vm2, %v1005_v4 }
 0x7a3   :  { %v4579_v5 = vpop.eup %4578  ;;  %4281 = vmatpush3.xpose.msk.msra.mxu1 %vm160_vm2, %v1239_v3  ;;  %4282 = vmatprep.mubr.msk.f32.mxu1 %vm4637_vm1, %v4636_v11 }
 0x7a4   :  { %v1004_v6 = vmul.f32 %v4579_v5, %v4575_v61  ;;  %4290 = vmatprep.subr.mxu1 %v4636_v11 }
 0x7a6   :  { %4268 = vmatmul.mubr.msk.f32.vlgmr.msra.gmra.mrb[12].mxu0 %vm160_vm2, %v1004_v6  ;;  %4283 = vmatmul.mubr.msk.f32.vlgmr.msra.gmra.mrb[12].mxu1 %vm160_vm2, %v1237_v7 }
 0x7a7   :  { %4276 = vmatpush3.xpose.msk.msra.mxu0 %vm160_vm2, %v1161_v1  ;;  %4277 = vmatprep.mubr.msk.f32.mxu0 %vm4637_vm1, %v4636_v11 }
 0x7a8   :  { %4285 = vmatprep.subr.mxu0 %v4636_v11  ;;  %4292 = vmatprep.mubr.msk.f32.mxu1 %vm4637_vm1, %v4636_v11 }
 0x7aa   :  { %4278 = vmatmul.mubr.msk.f32.vlgmr.msra.gmra.mrb[14].mxu0 %vm160_vm2, %v1159_v9 }
 0x7ab   :  { %4287 = vmatprep.mubr.msk.f32.mxu0 %vm4637_vm1, %v4636_v11 }
 0x875   :  { %v1154_v12 = vpop.f32.mrb[10].mxu1 }
 0x876   :  { %v4274_v13 = vpop.f32.mrb[11].mxu1 }
 0x879   :  { %v1078_v14 = vpop.f32.mrb[12].mxu0  ;;  %v1310_v17 = vpop.f32.mrb[12].mxu1 }
 0x87a   :  { %v1315_v18 = vmul.f32 0.35355338, %v1310_v17  ;;  %v4269_v19 = vpop.f32.mrb[13].mxu0  ;;  %v4284_v21 = vpop.f32.mrb[13].mxu1 }
 0x87c   :  { %v1317_v22 = vadd.f32 %v1315_v18, %v4799_v24 }
 0x87d   :  { %v1232_v23 = vpop.f32.mrb[14].mxu0 }
 0x87e   :  { %v1314_v25 = vmul.f32 0.35355338, %v1232_v23  ;;  %v4279_v26 = vpop.f32.mrb[15].mxu0  ;;  %v1321_v27 = vsel %vm160_vm2, %v1317_v22, -inf }
 0x87f   :  { %1322 = vmax.xlane.f32.xlu1 %v1321_v27 }
 0x880   :  { %v1316_v28 = vadd.f32 %v1314_v25, %v4799_v24 }
 0x882   :  { %v1318_v29 = vsel %vm160_vm2, %v1316_v28, -inf }
 0x883   :  { %1319 = vmax.xlane.f32.xlu0 %v1318_v29  ;;  %v1666_v29 = vld [vmem:[%s5535_s6 + $0x18] sm:$0xff] }
 0x890   :  { %1340 = vrot.lane.b32.xlu1 %v4776_v15, %s5551_s17 }
 0x894   :  { %1494 = vrot.lane.b32.xlu1 %v4879_v37, %s5549_s18 }
 0x898   :  { %1496 = vrot.lane.b32.xlu1 %v4877_v35, %s5549_s18 }
 0x89c   :  { %1504 = vrot.lane.b32.xlu1 %v1154_v12, %s5547_s19 }
 0x90c   :  { %v1323_v30 = vpop.xlane.xlu1 %1322 }
 0x90d   :  { %v1325_v31 = vsub.f32 %v1317_v22, %v1323_v30 }
 0x90f   :  { %v1328_v32 = vmul.f32 1.442695, %v1325_v31  ;;  %v1663_v31 = vld [vmem:[%s5535_s6] sm:$0xff] }
 0x910   :  { %v1341_v33 = vpop.permute.xlu1 %1340  ;;  %v1320_v34 = vpop.xlane.xlu0 %1319 }
 0x911   :  { %4580 = vpow2.f32 %v1328_v32  ;;  %v1324_v36 = vsub.f32 %v1316_v28, %v1320_v34  ;;  %4286 = vmatpush3.msra.mxu0 %v1341_v33  ;;  %v1665_v32 = vld [vmem:[%s5535_s6 + $0x10] sm:$0xff]  ;;  %v1668_v34 = vld [vmem:[%s5535_s6 + $0x28] sm:$0xff] }
 0x912   :  { %v4437_v33 = vpack.c.bf16 %v1665_v32, %v1663_v31  ;;  %v1799_v31 = vld [vmem:[%s5536_s8 + $0xe8] sm:$0xff] }
 0x913   :  { %v1326_v38 = vmul.f32 1.442695, %v1324_v36  ;;  %v1670_v36 = vld [vmem:[%s5535_s6 + $0x38] sm:$0xff] }
 0x914   :  { %v1495_v57 = vpop.permute.xlu1 %1494 }
 0x915   :  { %4582 = vpow2.f32 %v1326_v38  ;;  %v1516_v62 = vsel %vm160_vm2, %v4837_v56, %v1495_v57  ;;  %v3928_v56 = vld [vmem:[%s5534_s5] ss:$0 sm:$0xff] }
 0x916   :  { %v1667_v38 = vld [vmem:[%s5535_s6 + $0x20] sm:$0xff] }
 0x918   :  { %v1497_v59 = vpop.permute.xlu1 %1496 }
 0x919   :  { %v1517_v0 = vsel %vm160_vm2, %v4839_v58, %v1497_v59 }
 0x91b   :  { %v4581_v15 = vpop.eup %4580 }
 0x91c   :  { %v1333_v39 = vsel %vm160_vm2, %v4581_v15, 0.0  ;;  %v1505_v60 = vpop.permute.xlu1 %1504 }
 0x91d   :  { %1334 = vadd.xlane.f32.xlu0 %v1333_v39  ;;  %v1520_v3 = vsel %vm1518_vm4, %v1517_v0, %v1505_v60  ;;  %v1669_v39 = vld [vmem:[%s5535_s6 + $0x30] sm:$0xff]  ;;  %v1773_v0 = vld [vmem:[%s5536_s8 + $0x18] sm:$0xff] }
 0x91f   :  { %v4583_v37 = vpop.eup %4582 }
 0x920   :  { %v1330_v35 = vsel %vm160_vm2, %v4583_v37, 0.0 }
 0x921   :  { %1331 = vadd.xlane.f32.xlu0 %v1330_v35  ;;  %v1786_v35 = vld [vmem:[%s5536_s8 + $0x80] sm:$0xff] }
 0x937   :  { %1416 = vrot.lane.b32.xlu0 %v4780_v16, %s5551_s17  ;;  %v1524_v16 = vld [vmem:[%s5533_s4] sm:$0xff] }
 0x938   :  { %v4427_v48 = vpack.c.bf16 %v1525_v47, %v1524_v16 }
 0x93a   :  { %4428 = vmatprep.subr.bf16.mxu0 %v4427_v48 }
 0x93b   :  { %1502 = vrot.lane.b32.xlu0 %v1078_v14, %s5547_s19  ;;  %s5575_s19 = smov 24  }
 0x9aa   :  { %v1335_v40 = vpop.xlane.xlu0 %1334 }
 0x9ab   :  { %4584 = vrcp.f32 %v1335_v40  ;;  %v1787_v40 = vld [vmem:[%s5536_s8 + $0x88] sm:$0xff] }
 0x9ae   :  { %v1332_v41 = vpop.xlane.xlu0 %1331 }
 0x9af   :  { %4586 = vrcp.f32 %v1332_v41  ;;  %v4443_v41 = vpack.c.bf16 %v1787_v40, %v1786_v35  ;;  %v1784_v35 = vld [vmem:[%s5536_s8 + $0x70] sm:$0xff]  ;;  %v1785_v40 = vld [vmem:[%s5536_s8 + $0x78] sm:$0xff] }
 0x9b2   :  { %v1417_v42 = vpop.permute.xlu0 %1416 }
 0x9b3   :  { %4291 = vmatpush3.msra.mxu1 %v1417_v42 }
 0x9b5   :  { %v4585_v43 = vpop.eup %4584 }
 0x9b6   :  { %v1339_v44 = vmul.f32 %v4585_v43, %v4581_v15  ;;  %v1503_v61 = vpop.permute.xlu0 %1502  ;;  %v4439_v15 = vpack.c.bf16 %v1670_v36, %v1668_v34  ;;  %v1782_v34 = vld [vmem:[%s5536_s8 + $0x60] sm:$0xff]  ;;  %v1783_v36 = vld [vmem:[%s5536_s8 + $0x68] sm:$0xff] }
 0x9b7   :  { %v1519_v1 = vsel %vm1518_vm4, %v1516_v62, %v1503_v61 }
 0x9b8   :  { %4293 = vmatmul.mubr.msk.f32.vlgmr.msra.gmra.mrb[14].mxu1 %vm160_vm2, %v1339_v44 }
 0x9b9   :  { %v4587_v45 = vpop.eup %4586 }
 0x9ba   :  { %v1338_v46 = vmul.f32 %v4587_v45, %v4583_v37  ;;  %v4441_v37 = vpack.c.bf16 %v1669_v39, %v1667_v38  ;;  %v4469_v38 = vpack.c.bf16 %v1783_v36, %v1782_v34  ;;  %v1801_v39 = vld [vmem:[%s5536_s8 + $0xf8] sm:$0xff]  ;;  %v3936_v36 = vld [vmem:[%s5541_s12] ss:$0 sm:$0xff] }
 0x9bc   :  { %4288 = vmatmul.mubr.msk.f32.vlgmr.msra.gmra.mrb[16].mxu0 %vm160_vm2, %v1338_v46 }
 0x9bd   :  { %4430 = vmatpush3.bf16.msra.mxu0 %v4427_v48  ;;  %v3931_v48 = vld [vmem:[%s5537_s10] ss:$0 sm:$0xff] }
 0x9be   :  { %4432 = vmatprep.subr.bf16.mxu0 %v4431_v51 }
 0x9c1   :  { %4434 = vmatpush3.bf16.msra.mxu0 %v4431_v51  ;;  %v1771_v51 = vld [vmem:[%s5536_s8 + $0x8] sm:$0xff] }
 0x9c2   :  { %v4445_v59 = vpack.c.bf16 %v1771_v51, %v1770_v50 }
 0xa8b   :  { %v1488_v52 = vpop.f32.mrb[14].mxu1 }
 0xa8c   :  { %1512 = vrot.lane.b32.xlu1 %v1488_v52, %s5557_s20  ;;  %v4294_v53 = vpop.f32.mrb[15].mxu1  ;;  %v3932_v52 = vld [vmem:[%s5538_s11] ss:$0 sm:$0xff] }
 0xa8d   :  { %v1788_v53 = vld [vmem:[%s5536_s8 + $0x90] sm:$0xff] }
 0xa8f   :  { %v1412_v54 = vpop.f32.mrb[16].mxu0 }
 0xa90   :  { %1510 = vrot.lane.b32.xlu0 %v1412_v54, %s5557_s20  ;;  %v4289_v55 = vpop.f32.mrb[17].mxu0  ;;  %v1789_v54 = vld [vmem:[%s5536_s8 + $0x98] sm:$0xff] }
 0xa91   :  { %v4447_v62 = vpack.c.bf16 %v1789_v54, %v1788_v53 }
 0xafe   :  { %v1513_v63 = vpop.permute.xlu1 %1512 }
 0xaff   :  { %v1523_v5 = vsel %vm1521_vm5, %v1520_v3, %v1513_v63  ;;  %v1772_v63 = vld [vmem:[%s5536_s8 + $0x10] sm:$0xff] }
 0xb02   :  { %v1511_v2 = vpop.permute.xlu0 %1510 }
 0xb03   :  { %v1522_v4 = vsel %vm1521_vm5, %v1519_v1, %v1511_v2  ;;  %v1790_v1 = vld [vmem:[%s5536_s8 + $0xa0] sm:$0xff]  ;;  %v1791_v2 = vld [vmem:[%s5536_s8 + $0xa8] sm:$0xff] }
 0xb04   :  { %4303 = vmatprep.mubr.msk.f32.mxu0 %vm75_vm0, %v1522_v4  ;;  %v4449_v4 = vpack.c.bf16 %v1773_v0, %v1772_v63 }
 0xb05   :  { %4304 = vmatmul.mubr.msk.f32.vlgmr.msra.gmra.mrb[18].mxu0 %vm75_vm0, %v1523_v5 }
 0xb06   :  { %1753 = vmatprep.mubr.f32.mxu0 %v4636_v11 }
 0xbd8   :  { %v4305_v58 = vpop.f32.mrb[18].mxu0 }
 0xbd9   :  { %v1613_v6 = vadd.f32 %v4305_v58, %v3928_v56  ;;  %v1607_v7 = vpop.f32.mrb[19].mxu0  ;;  %v1774_v58 = vld [vmem:[%s5536_s8 + $0x20] sm:$0xff] }
 0xbda   :  { %v1608_v9 = vadd.f32 %v3928_v56, %v1607_v7  ;;  %v4451_v56 = vpack.c.bf16 %v1791_v2, %v1790_v1  ;;  %v1792_v7 = vld [vmem:[%s5536_s8 + $0xb0] sm:$0xff] }
 0xbdb   :  { %v1617_v12 = vadd.f32 %v1613_v6, %v4763_v10  ;;  %v1775_v6 = vld [vmem:[%s5536_s8 + $0x28] sm:$0xff] }
 0xbdc   :  { %v1616_v13 = vadd.f32 %v1608_v9, %v4756_v8  ;;  %v1664_v8 = vld [vmem:[%s5535_s6 + $0x8] sm:$0xff]  ;;  %v1793_v9 = vld [vmem:[%s5536_s8 + $0xb8] sm:$0xff] }
 0xbdd   :  { %v1623_v14 = vsel %vm75_vm0, %v1617_v12, 0.0  ;;  %v4435_v30 = vpack.c.bf16 %v1666_v29, %v1664_v8  ;;  %v1780_v8 = vld [vmem:[%s5536_s8 + $0x50] sm:$0xff]  ;;  %v1781_v29 = vld [vmem:[%s5536_s8 + $0x58] sm:$0xff] }
 0xbde   :  { %1624 = vadd.xlane.f32.xlu1 %v1623_v14  ;;  %v1620_v17 = vsel %vm75_vm0, %v1616_v13, 0.0  ;;  %v1776_v14 = vld [vmem:[%s5536_s8 + $0x30] sm:$0xff]  ;;  %v4465_v32 = vpack.c.bf16 %v1781_v29, %v1780_v8 }
 0xbdf   :  { %1621 = vadd.xlane.f32.xlu0 %v1620_v17  ;;  %4436 = vmatprep.subr.bf16.mxu0 %v4435_v30  ;;  %v1777_v17 = vld [vmem:[%s5536_s8 + $0x38] sm:$0xff]  ;;  %v1798_v30 = vld [vmem:[%s5536_s8 + $0xe0] sm:$0xff] }
 0xbe0   :  { %4438 = vmatpush1.bf16.msra.mxu0 %v4437_v33  ;;  %v4467_v33 = vpack.c.bf16 %v1799_v31, %v1798_v30 }
 0xbe1   :  { %4440 = vmatprep.subr.bf16.mxu0 %v4439_v15  ;;  %v1800_v15 = vld [vmem:[%s5536_s8 + $0xf0] sm:$0xff] }
 0xbe4   :  { %4442 = vmatpush1.bf16.msra.mxu0 %v4441_v37  ;;  %v4471_v37 = vpack.c.bf16 %v1801_v39, %v1800_v15  ;;  %v3937_v15 = vld [vmem:[%s5542_s13] ss:$0 sm:$0xff] }
 0xbe5   :  { %4444 = vmatprep.subr.bf16.mxu0 %v4443_v41  ;;  %v4473_v41 = vpack.c.bf16 %v1785_v40, %v1784_v35 }
 0xc6b   :  { %v1625_v18 = vpop.xlane.xlu1 %1624 }
 0xc6c   :  { %v1628_v19 = vmul.f32 0.03125, %v1625_v18  ;;  %v1622_v21 = vpop.xlane.xlu0 %1621  ;;  %v1794_v18 = vld [vmem:[%s5536_s8 + $0xc0] sm:$0xff] }
 0xc6d   :  { %v1627_v22 = vmul.f32 0.03125, %v1622_v21  ;;  %v4457_v21 = vpack.c.bf16 %v1777_v17, %v1776_v14 }
 0xc6e   :  { %v1630_v23 = vsub.f32 %v1617_v12, %v1628_v19  ;;  %v4453_v12 = vpack.c.bf16 %v1775_v6, %v1774_v58  ;;  %v1795_v19 = vld [vmem:[%s5536_s8 + $0xc8] sm:$0xff] }
 0xc6f   :  { %v1629_v25 = vsub.f32 %v1616_v13, %v1627_v22  ;;  %v4455_v13 = vpack.c.bf16 %v1793_v9, %v1792_v7  ;;  %v4459_v22 = vpack.c.bf16 %v1795_v19, %v1794_v18 }
 0xc70   :  { %v1632_v28 = vmul.f32 %v1630_v23, %v1630_v23 }
 0xc71   :  { %v1631_v26 = vmul.f32 %v1629_v25, %v1629_v25 }
 0xc72   :  { %v1636_v10 = vsel %vm75_vm0, %v1632_v28, 0.0 }
 0xc73   :  { %v1633_v27 = vsel %vm75_vm0, %v1631_v26, 0.0  ;;  %v1796_v26 = vld [vmem:[%s5536_s8 + $0xd0] sm:$0xff] }
 0xc74   :  { %1634 = vadd.xlane.f32.xlu0 %v1633_v27  ;;  %v1797_v27 = vld [vmem:[%s5536_s8 + $0xd8] sm:$0xff] }
 0xc78   :  { %1637 = vadd.xlane.f32.xlu0 %v1636_v10  ;;  %v4463_v10 = vpack.c.bf16 %v1797_v27, %v1796_v26  ;;  %v3940_v27 = vld [vmem:[%s5566_s23 + $0x30] sm:$0xff] }
 0xd01   :  { %v1635_v42 = vpop.xlane.xlu0 %1634 }
 0xd02   :  { %v1639_v43 = vmul.f32 0.03125, %v1635_v42  ;;  %v1675_v42 = vsub.s32 0, %v4796_v20 }
 0xd04   :  { %v1641_v44 = vadd.f32 1e-05, %v1639_v43  ;;  %v1671_v43 = vld [vmem:[%s5539_s7] sm:$0x3] }
 0xd05   :  { %v1638_v45 = vpop.xlane.xlu0 %1637 }
 0xd06   :  { %4588 = vrsqrt.f32 %v1641_v44  ;;  %v1640_v46 = vmul.f32 0.03125, %v1638_v45  ;;  %v1679_v44 = vsub.s32 1, %v4796_v20  ;;  %v1676_v45 = vrot.slane %v1671_v43, %v1675_v42  ;;  %v4026_v20 = vld [vmem:[%s5540_s9 + $0x1] ss:$0 sm:$0xff] }
 0xd08   :  { %v1642_v16 = vadd.f32 1e-05, %v1640_v46  ;;  %v1680_v46 = vrot.slane %v1671_v43, %v1679_v44 }
 0xd0a   :  { %4590 = vrsqrt.f32 %v1642_v16 }
 0xd10   :  { %v4589_v47 = vpop.eup %4588 }
 0xd11   :  { %v1645_v49 = vmul.f32 %v4589_v47, %v1629_v25  ;;  %v1779_v25 = vld [vmem:[%s5536_s8 + $0x48] sm:$0xff] }
 0xd13   :  { %v1653_v55 = vmul.f32 %v3931_v48, %v1645_v49 }
 0xd14   :  { %v4591_v57 = vpop.eup %4590 }
 0xd15   :  { %v5017_v60 = vadd.f32 %v3932_v52, %v1653_v55  ;;  %v1646_v61 = vmul.f32 %v4591_v57, %v1630_v23  ;;  %v1778_v23 = vld [vmem:[%s5536_s8 + $0x40] sm:$0xff] }
 0xd16   :  { %v4461_v28 = vpack.c.bf16 %v1779_v25, %v1778_v23  ;;  %v3939_v25 = vld [vmem:[%s5566_s23 + $0x28] sm:$0xff] }
 0xd17   :  { %3933 = vmatmul.mubr.msk.f32.vlgmr.msra.gmra.mrb[20].mxu0 %vm75_vm0, %v5017_v60  ;;  %v1654_v3 = vmul.f32 %v3931_v48, %v1646_v61 }
 0xd18   :  { %1759 = vmatprep.mubr.f32.mxu0 %v4636_v11  ;;  %4446 = vmatpush3.bf16.msra.mxu0 %v4445_v59 }
 0xd19   :  { %v5034_v5 = vadd.f32 %v3932_v52, %v1654_v3  ;;  %4448 = vmatprep.subr.bf16.mxu0 %v4447_v62  ;;  %v3935_v62 = vld [vmem:[%s5540_s9] ss:$0 sm:$0xff] }
 0xd1b   :  { %3934 = vmatmul.mubr.msk.f32.gmra.mrb[22].mxu0 %vm75_vm0, %v5034_v5 }
 0xd1c   :  { %4450 = vmatpush3.bf16.msra.mxu0 %v4449_v4 }
 0xd1d   :  { %4452 = vmatprep.subr.bf16.mxu0 %v4451_v56 }
 0xd20   :  { %4454 = vmatpush3.bf16.msra.mxu0 %v4453_v12 }
 0xd21   :  { %4456 = vmatprep.subr.bf16.mxu0 %v4455_v13 }
 0xd24   :  { %4458 = vmatpush3.bf16.msra.mxu0 %v4457_v21 }
 0xd25   :  { %4460 = vmatprep.subr.bf16.mxu0 %v4459_v22 }
 0xd28   :  { %4462 = vmatpush3.bf16.msra.mxu0 %v4461_v28  ;;  %v3941_v28 = vld [vmem:[%s5566_s23 + $0x38] sm:$0xff] }
 0xd29   :  { %4464 = vmatprep.subr.bf16.mxu0 %v4463_v10  ;;  %v4479_v10 = vpack.c.bf16 %v3941_v28, %v3940_v27 }
 0xd2c   :  { %4466 = vmatpush3.bf16.msra.mxu0 %v4465_v32 }
 0xd2d   :  { %4468 = vmatprep.subr.bf16.mxu0 %v4467_v33 }
 0xd30   :  { %4470 = vmatpush3.bf16.msra.mxu0 %v4469_v38 }
 0xd31   :  { %4472 = vmatprep.subr.bf16.mxu0 %v4471_v37 }
 0xd34   :  { %4474 = vmatpush3.bf16.msra.mxu0 %v4473_v41 }
 0xd35   :  { %4352 = vmatprep.subr.mxu0 %v4636_v11 }
 0xdea   :  { %v1755_v16 = vpop.f32.mrb[20].mxu0 }
 0xdeb   :  { %v1756_v47 = vadd.f32 %v1755_v16, %v1676_v45  ;;  %v1757_v48 = vpop.f32.mrb[21].mxu0 }
 0xdec   :  { %v1758_v49 = vadd.f32 %v1757_v48, %v1680_v46 }
 0xded   :  { %v1766_v52 = vmax.f32 %v1756_v47, 0.0 }
 0xdee   :  { %v1767_v50 = vmax.f32 %v1758_v49, 0.0  ;;  %v1761_v51 = vpop.f32.mrb[22].mxu0 }
 0xdef   :  { %v1762_v53 = vadd.f32 %v1761_v51, %v1676_v45  ;;  %v1763_v54 = vpop.f32.mrb[23].mxu0  ;;  %v3943_v45 = vld [vmem:[%s5532_s3 + $0x1] ss:$0 sm:$0xff]  ;;  %s5567_s3 = smov 80  }
 0xdf0   :  { %v1764_v55 = vadd.f32 %v1763_v54, %v1680_v46  ;;  %1873 = vmatprep.mubr.f32.mxu0 %v1767_v50 }
 0xdf1   :  { %1874 = vmatmul.mubr.f32.vlgmr.msra.gmra.mrb[24].mxu0 %v1766_v52  ;;  %v1768_v59 = vmax.f32 %v1762_v53, 0.0 }
 0xdf2   :  { %v1769_v57 = vmax.f32 %v1764_v55, 0.0 }
 0xdf4   :  { %1878 = vmatprep.mubr.f32.mxu0 %v1769_v57 }
 0xdf5   :  { %1879 = vmatmul.mubr.f32.gmra.mrb[26].mxu0 %v1768_v59 }
 0xdf6   :  { %4354 = vmatprep.mubr.msk.f32.mxu0 %vm4637_vm1, %v4636_v11 }
 0xec4   :  { %v4110_v61 = vpop.f32.mrb[24].mxu0 }
 0xec5   :  { %v4111_v63 = vpop.f32.mrb[25].mxu0 }
 0xec6   :  { %v4112_v0 = vadd.f32 %v4111_v63, %v4110_v61 }
 0xec8   :  { %v1876_v1 = vadd.f32 %v4112_v0, %v3935_v62  ;;  %v4113_v2 = vpop.f32.mrb[26].mxu0 }
 0xec9   :  { %v4114_v3 = vpop.f32.mrb[27].mxu0 }
 0xeca   :  { %v4115_v4 = vadd.f32 %v4114_v3, %v4113_v2  ;;  %v1884_v56 = vadd.f32 %v1876_v1, %v5017_v60 }
 0xecc   :  { %v1881_v58 = vadd.f32 %v4115_v4, %v3935_v62  ;;  %v1888_v6 = vsel %vm75_vm0, %v1884_v56, 0.0 }
 0xecd   :  { %1889 = vadd.xlane.f32.xlu1 %v1888_v6 }
 0xece   :  { %v1885_v7 = vadd.f32 %v1881_v58, %v5034_v5  ;;  %v3938_v5 = vld [vmem:[%s5566_s23 + $0x20] sm:$0xff] }
 0xecf   :  { %v4475_v26 = vpack.c.bf16 %v3939_v25, %v3938_v5 }
 0xed0   :  { %v1891_v9 = vsel %vm75_vm0, %v1885_v7, 0.0 }
 0xed1   :  { %1892 = vadd.xlane.f32.xlu0 %v1891_v9  ;;  %4476 = vmatprep.subr.bf16.mxu1 %v4475_v26 }
 0xed2   :  { %4478 = vmatpush3.bf16.msra.mxu1 %v4475_v26 }
 0xed3   :  { %4480 = vmatprep.subr.bf16.mxu1 %v4479_v10 }
 0xed6   :  { %4482 = vmatpush3.bf16.msra.mxu1 %v4479_v10 }
 0xed7   :  { %4317 = vmatprep.subr.mxu1 %v4636_v11 }
 0xf5a   :  { %v1890_v12 = vpop.xlane.xlu1 %1889 }
 0xf5b   :  { %v1894_v13 = vmul.f32 0.03125, %v1890_v12 }
 0xf5d   :  { %v1896_v14 = vsub.f32 %v1884_v56, %v1894_v13 }
 0xf5e   :  { %v1893_v17 = vpop.xlane.xlu0 %1892 }
 0xf5f   :  { %v1895_v18 = vmul.f32 0.03125, %v1893_v17  ;;  %v1898_v19 = vmul.f32 %v1896_v14, %v1896_v14 }
 0xf61   :  { %v1897_v21 = vsub.f32 %v1885_v7, %v1895_v18  ;;  %v1900_v22 = vsel %vm75_vm0, %v1898_v19, 0.0 }
 0xf62   :  { %1901 = vadd.xlane.f32.xlu1 %v1900_v22 }
 0xf63   :  { %v1899_v60 = vmul.f32 %v1897_v21, %v1897_v21 }
 0xf65   :  { %v1903_v23 = vsel %vm75_vm0, %v1899_v60, 0.0 }
 0xf66   :  { %1904 = vadd.xlane.f32.xlu0 %v1903_v23 }
 0xfef   :  { %v1902_v8 = vpop.xlane.xlu1 %1901 }
 0xff0   :  { %v1906_v29 = vmul.f32 0.03125, %v1902_v8 }
 0xff2   :  { %v1908_v30 = vadd.f32 1e-05, %v1906_v29 }
 0xff3   :  { %v1905_v31 = vpop.xlane.xlu0 %1904 }
 0xff4   :  { %4592 = vrsqrt.f32 %v1908_v30  ;;  %v1907_v32 = vmul.f32 0.03125, %v1905_v31 }
 0xff6   :  { %v1909_v33 = vadd.f32 1e-05, %v1907_v32 }
 0xff8   :  { %4594 = vrsqrt.f32 %v1909_v33 }
 0xffe   :  { %v4593_v34 = vpop.eup %4592 }
 0xfff   :  { %v1912_v38 = vmul.f32 %v4593_v34, %v1896_v14 }
0x1001   :  { %v1920_v39 = vmul.f32 %v3936_v36, %v1912_v38 }
0x1002   :  { %v4595_v37 = vpop.eup %4594 }
0x1003   :  { %v1913_v35 = vmul.f32 %v4595_v37, %v1897_v21  ;;  %v5144_v40 = vadd.f32 %v3937_v15, %v1920_v39 }
0x1005   :  { %v1921_v41 = vmul.f32 %v3936_v36, %v1913_v35  ;;  %4314 = vmatprep.mubr.msk.f32.mxu1 %vm75_vm0, %v5144_v40 }
0x1007   :  { %v5148_v43 = vadd.f32 %v3937_v15, %v1921_v41 }
0x1009   :  { %4315 = vmatmul.mubr.msk.f32.vlgmr.msra.gmra.mrb[16].mxu1 %vm75_vm0, %v5148_v43 }
0x100a   :  { %4319 = vmatprep.mubr.msk.f32.mxu1 %vm4637_vm1, %v4636_v11 }
0x10dc   :  { %v4316_v46 = vpop.f32.mrb[16].mxu1 }
0x10dd   :  { %v5157_v16 = vadd.f32 %v4316_v46, %v3943_v45  ;;  %v2015_v47 = vpop.f32.mrb[17].mxu1 }
0x10de   :  { %v5159_v48 = vadd.f32 %v3943_v45, %v2015_v47 }
0x10df   :  { %2102 = vrot.lane.b32.xlu0 %v5157_v16, %s4638_s21 }
0x10e0   :  { %2025 = vrot.lane.b32.xlu1 %v5159_v48, %s4638_s21  ;;  %s5568_s21 = smov 112  }
0x1151   :  { %v2103_v50 = vpop.permute.xlu0 %2102 }
0x1152   :  { %v2026_v49 = vpop.permute.xlu1 %2025 }
0x1153   :  { %4318 = vmatpush3.xpose.msk.msra.mxu1 %vm160_vm2, %v2026_v49 }
0x1154   :  { %4322 = vmatprep.subr.mxu1 %v4636_v11 }
0x1156   :  { %4320 = vmatmul.mubr.msk.f32.vlgmr.msra.gmra.mrb[18].mxu1 %vm160_vm2, %v5159_v48 }
0x1157   :  { %4323 = vmatpush3.xpose.msk.msra.mxu1 %vm160_vm2, %v2103_v50  ;;  %4324 = vmatprep.mubr.msk.f32.mxu1 %vm4637_vm1, %v4636_v11 }
0x1158   :  { %4327 = vmatprep.subr.mxu1 %v4636_v11 }
0x115a   :  { %4325 = vmatmul.mubr.msk.f32.vlgmr.msra.gmra.mrb[20].mxu1 %vm160_vm2, %v5157_v16 }
0x115b   :  { %4329 = vmatprep.mubr.msk.f32.mxu1 %vm4637_vm1, %v4636_v11 }
0x1229   :  { %v2097_v51 = vpop.f32.mrb[18].mxu1 }
0x122a   :  { %v2178_v52 = vmul.f32 0.35355338, %v2097_v51  ;;  %v4321_v53 = vpop.f32.mrb[19].mxu1 }
0x122c   :  { %v2180_v54 = vadd.f32 %v2178_v52, %v4799_v24 }
0x122d   :  { %v2174_v55 = vpop.f32.mrb[20].mxu1 }
0x122e   :  { %v2179_v57 = vmul.f32 0.35355338, %v2174_v55  ;;  %v4326_v59 = vpop.f32.mrb[21].mxu1  ;;  %v2182_v61 = vsel %vm160_vm2, %v2180_v54, -inf }
0x122f   :  { %2183 = vmax.xlane.f32.xlu1 %v2182_v61 }
0x1230   :  { %v2181_v62 = vadd.f32 %v2179_v57, %v4799_v24 }
0x1232   :  { %v2185_v63 = vsel %vm160_vm2, %v2181_v62, -inf }
0x1233   :  { %2186 = vmax.xlane.f32.xlu0 %v2185_v63 }
0x1240   :  { %2204 = vrot.lane.b32.xlu1 %v5159_v48, %s4640_s22 }
0x12bc   :  { %v2184_v0 = vpop.xlane.xlu1 %2183 }
0x12bd   :  { %v2188_v1 = vsub.f32 %v2180_v54, %v2184_v0 }
0x12bf   :  { %v2190_v2 = vmul.f32 1.442695, %v2188_v1 }
0x12c0   :  { %v2205_v3 = vpop.permute.xlu1 %2204  ;;  %v2187_v4 = vpop.xlane.xlu0 %2186 }
0x12c1   :  { %4596 = vpow2.f32 %v2190_v2  ;;  %v2189_v56 = vsub.f32 %v2181_v62, %v2187_v4  ;;  %4328 = vmatpush3.msra.mxu1 %v2205_v3 }
0x12c2   :  { %4332 = vmatprep.subr.mxu1 %v4636_v11 }
0x12c3   :  { %v2192_v58 = vmul.f32 1.442695, %v2189_v56 }
0x12c5   :  { %4598 = vpow2.f32 %v2192_v58 }
0x12cb   :  { %v4597_v6 = vpop.eup %4596 }
0x12cc   :  { %v2194_v7 = vsel %vm160_vm2, %v4597_v6, 0.0 }
0x12cd   :  { %2195 = vadd.xlane.f32.xlu1 %v2194_v7 }
0x12cf   :  { %v4599_v9 = vpop.eup %4598 }
0x12d0   :  { %v2197_v12 = vsel %vm160_vm2, %v4599_v9, 0.0 }
0x12d1   :  { %2198 = vadd.xlane.f32.xlu0 %v2197_v12 }
0x12de   :  { %2358 = vrot.lane.b32.xlu1 %v5159_v48, %s4641_s24 }
0x12e2   :  { %2356 = vrot.lane.b32.xlu1 %v5159_v48, %s4642_s25 }
0x12e6   :  { %2434 = vrot.lane.b32.xlu1 %v5157_v16, %s4642_s25  ;;  %s5571_s25 = smov 104  }
0x12e7   :  { %2280 = vrot.lane.b32.xlu0 %v5157_v16, %s4640_s22  ;;  %s5569_s22 = smov 48  }
0x12eb   :  { %2436 = vrot.lane.b32.xlu0 %v5157_v16, %s4641_s24  ;;  %s5570_s24 = smov 72  }
0x135a   :  { %v2196_v13 = vpop.xlane.xlu1 %2195 }
0x135b   :  { %4600 = vrcp.f32 %v2196_v13 }
0x135e   :  { %v2199_v14 = vpop.xlane.xlu0 %2198  ;;  %v2359_v22 = vpop.permute.xlu1 %2358 }
0x135f   :  { %4602 = vrcp.f32 %v2199_v14 }
0x1362   :  { %v2281_v19 = vpop.permute.xlu0 %2280  ;;  %v2357_v23 = vpop.permute.xlu1 %2356 }
0x1365   :  { %v4601_v17 = vpop.eup %4600 }
0x1366   :  { %v2202_v18 = vmul.f32 %v4601_v17, %v4597_v6  ;;  %v2437_v5 = vpop.permute.xlu0 %2436  ;;  %v2435_v25 = vpop.permute.xlu1 %2434 }
0x1368   :  { %4330 = vmatmul.mubr.msk.f32.vlgmr.msra.gmra.mrb[22].mxu1 %vm160_vm2, %v2202_v18 }
0x1369   :  { %v4603_v21 = vpop.eup %4602  ;;  %4333 = vmatpush3.msra.mxu1 %v2281_v19  ;;  %4334 = vmatprep.mubr.msk.f32.mxu1 %vm4637_vm1, %v4636_v11 }
0x136a   :  { %v2203_v60 = vmul.f32 %v4603_v21, %v4599_v9  ;;  %4337 = vmatprep.subr.mxu1 %v4636_v11 }
0x136c   :  { %4335 = vmatmul.mubr.msk.f32.vlgmr.msra.gmra.mrb[24].mxu1 %vm160_vm2, %v2203_v60 }
0x136d   :  { %4339 = vmatprep.mubr.msk.f32.mxu1 %vm4637_vm1, %v4636_v11 }
0x1370   :  { %4338 = vmatpush3.xpose.msk.msra.mxu1 %vm160_vm2, %v2359_v22 }
0x1371   :  { %4342 = vmatprep.subr.mxu1 %v4636_v11 }
0x1373   :  { %4340 = vmatmul.mubr.msk.f32.vlgmr.msra.gmra.mrb[26].mxu1 %vm160_vm2, %v2357_v23 }
0x1374   :  { %4343 = vmatpush3.xpose.msk.msra.mxu1 %vm160_vm2, %v2437_v5  ;;  %4344 = vmatprep.mubr.msk.f32.mxu1 %vm4637_vm1, %v4636_v11 }
0x1375   :  { %4347 = vmatprep.subr.mxu1 %v4636_v11 }
0x1377   :  { %4345 = vmatmul.mubr.msk.f32.vlgmr.msra.gmra.mrb[28].mxu1 %vm160_vm2, %v2435_v25 }
0x1378   :  { %4349 = vmatprep.mubr.msk.f32.mxu1 %vm4637_vm1, %v4636_v11 }
0x143b   :  { %v5213_v26 = vpop.f32.mrb[22].mxu1 }
0x143c   :  { %v4331_v27 = vpop.f32.mrb[23].mxu1 }
0x143f   :  { %v5215_v28 = vpop.f32.mrb[24].mxu1 }
0x1440   :  { %v4336_v10 = vpop.f32.mrb[25].mxu1 }
0x1446   :  { %v2430_v8 = vpop.f32.mrb[26].mxu1 }
0x1447   :  { %v2512_v29 = vmul.f32 0.35355338, %v2430_v8  ;;  %v4341_v30 = vpop.f32.mrb[27].mxu1 }
0x1449   :  { %v2514_v31 = vadd.f32 %v2512_v29, %v4799_v24 }
0x144a   :  { %v2508_v32 = vpop.f32.mrb[28].mxu1 }
0x144b   :  { %v2513_v33 = vmul.f32 0.35355338, %v2508_v32  ;;  %v4346_v34 = vpop.f32.mrb[29].mxu1  ;;  %v2516_v36 = vsel %vm160_vm2, %v2514_v31, -inf }
0x144c   :  { %2517 = vmax.xlane.f32.xlu0 %v2516_v36 }
0x144d   :  { %v2515_v38 = vadd.f32 %v2513_v33, %v4799_v24 }
0x144f   :  { %v2519_v15 = vsel %vm160_vm2, %v2515_v38, -inf }
0x1450   :  { %2520 = vmax.xlane.f32.xlu1 %v2519_v15 }
0x1461   :  { %2538 = vrot.lane.b32.xlu1 %v5159_v48, %s4643_s26 }
0x1462   :  { %2614 = vrot.lane.b32.xlu0 %v5157_v16, %s4643_s26  ;;  %s5572_s26 = smov 40  }
0x1465   :  { %2692 = vrot.lane.b32.xlu1 %v5159_v48, %s5567_s3 }
0x1469   :  { %2770 = vrot.lane.b32.xlu1 %v5157_v16, %s5567_s3 }
0x146d   :  { %2768 = vrot.lane.b32.xlu1 %v5157_v16, %s5568_s21 }
0x14d9   :  { %v2518_v39 = vpop.xlane.xlu0 %2517 }
0x14da   :  { %v2522_v37 = vsub.f32 %v2514_v31, %v2518_v39 }
0x14dc   :  { %v2524_v35 = vmul.f32 1.442695, %v2522_v37 }
0x14dd   :  { %v2615_v41 = vpop.permute.xlu0 %2614  ;;  %v2521_v45 = vpop.xlane.xlu1 %2520 }
0x14de   :  { %4604 = vpow2.f32 %v2524_v35  ;;  %v2523_v46 = vsub.f32 %v2515_v38, %v2521_v45  ;;  %4353 = vmatpush3.msra.mxu0 %v2615_v41 }
0x14df   :  { %4362 = vmatprep.subr.mxu0 %v4636_v11 }
0x14e0   :  { %v2526_v47 = vmul.f32 1.442695, %v2523_v46 }
0x14e1   :  { %v2539_v49 = vpop.permute.xlu1 %2538 }
0x14e2   :  { %4606 = vpow2.f32 %v2526_v47  ;;  %4348 = vmatpush3.msra.mxu1 %v2539_v49 }
0x14e3   :  { %4357 = vmatprep.subr.mxu1 %v4636_v11 }
0x14e5   :  { %v2693_v57 = vpop.permute.xlu1 %2692 }
0x14e8   :  { %v4605_v50 = vpop.eup %4604 }
0x14e9   :  { %v2528_v51 = vsel %vm160_vm2, %v4605_v50, 0.0  ;;  %v2771_v63 = vpop.permute.xlu1 %2770 }
0x14ea   :  { %2529 = vadd.xlane.f32.xlu0 %v2528_v51 }
0x14ec   :  { %v4607_v52 = vpop.eup %4606 }
0x14ed   :  { %v2531_v53 = vsel %vm160_vm2, %v4607_v52, 0.0  ;;  %v2769_v2 = vpop.permute.xlu1 %2768 }
0x14ee   :  { %2532 = vadd.xlane.f32.xlu0 %v2531_v53 }
0x1504   :  { %2690 = vrot.lane.b32.xlu0 %v5159_v48, %s5568_s21 }
0x1577   :  { %v2530_v54 = vpop.xlane.xlu0 %2529 }
0x1578   :  { %4608 = vrcp.f32 %v2530_v54 }
0x157b   :  { %v2533_v55 = vpop.xlane.xlu0 %2532 }
0x157c   :  { %4610 = vrcp.f32 %v2533_v55 }
0x157f   :  { %v2691_v1 = vpop.permute.xlu0 %2690 }
0x1582   :  { %v4609_v59 = vpop.eup %4608 }
0x1583   :  { %v2536_v61 = vmul.f32 %v4609_v59, %v4605_v50 }
0x1585   :  { %4350 = vmatmul.mubr.msk.f32.vlgmr.msra.gmra.mrb[30].mxu1 %vm160_vm2, %v2536_v61 }
0x1586   :  { %v4611_v62 = vpop.eup %4610  ;;  %4358 = vmatpush3.xpose.msk.msra.mxu1 %vm160_vm2, %v2693_v57  ;;  %4359 = vmatprep.mubr.msk.f32.mxu1 %vm4637_vm1, %v4636_v11 }
0x1587   :  { %v2537_v0 = vmul.f32 %v4611_v62, %v4607_v52  ;;  %4367 = vmatprep.subr.mxu1 %v4636_v11 }
0x1589   :  { %4355 = vmatmul.mubr.msk.f32.vlgmr.msra.gmra.mrb[28].mxu0 %vm160_vm2, %v2537_v0  ;;  %4360 = vmatmul.mubr.msk.f32.vlgmr.msra.gmra.mrb[32].mxu1 %vm160_vm2, %v2691_v1 }
0x158a   :  { %4363 = vmatpush3.xpose.msk.msra.mxu0 %vm160_vm2, %v2771_v63  ;;  %4364 = vmatprep.mubr.msk.f32.mxu0 %vm4637_vm1, %v4636_v11 }
0x158b   :  { %4372 = vmatprep.subr.mxu0 %v4636_v11  ;;  %4369 = vmatprep.mubr.msk.f32.mxu1 %vm4637_vm1, %v4636_v11 }
0x158d   :  { %4365 = vmatmul.mubr.msk.f32.vlgmr.msra.gmra.mrb[30].mxu0 %vm160_vm2, %v2769_v2 }
0x158e   :  { %4374 = vmatprep.mubr.msk.f32.mxu0 %vm4637_vm1, %v4636_v11 }
0x1658   :  { %v5253_v3 = vpop.f32.mrb[30].mxu1 }
0x1659   :  { %v4351_v4 = vpop.f32.mrb[31].mxu1 }
0x165c   :  { %v5255_v56 = vpop.f32.mrb[28].mxu0  ;;  %v2764_v58 = vpop.f32.mrb[32].mxu1 }
0x165d   :  { %v2846_v6 = vmul.f32 0.35355338, %v2764_v58  ;;  %v4356_v7 = vpop.f32.mrb[29].mxu0  ;;  %v4361_v9 = vpop.f32.mrb[33].mxu1 }
0x165f   :  { %v2848_v12 = vadd.f32 %v2846_v6, %v4799_v24 }
0x1660   :  { %v2842_v13 = vpop.f32.mrb[30].mxu0 }
0x1661   :  { %v2847_v14 = vmul.f32 0.35355338, %v2842_v13  ;;  %v4366_v17 = vpop.f32.mrb[31].mxu0  ;;  %v2850_v18 = vsel %vm160_vm2, %v2848_v12, -inf }
0x1662   :  { %2851 = vmax.xlane.f32.xlu0 %v2850_v18 }
0x1663   :  { %v2849_v19 = vadd.f32 %v2847_v14, %v4799_v24 }
0x1665   :  { %v2853_v21 = vsel %vm160_vm2, %v2849_v19, -inf }
0x1666   :  { %2854 = vmax.xlane.f32.xlu1 %v2853_v21  ;;  %v3971_v21 = vld [vmem:[%s5533_s4 + $0x28] sm:$0xff] }
0x1677   :  { %2872 = vrot.lane.b32.xlu1 %v5159_v48, %s5569_s22 }
0x1678   :  { %2948 = vrot.lane.b32.xlu0 %v5157_v16, %s5569_s22 }
0x167b   :  { %3026 = vrot.lane.b32.xlu1 %v5159_v48, %s5570_s24 }
0x167f   :  { %3104 = vrot.lane.b32.xlu1 %v5157_v16, %s5570_s24 }
0x1683   :  { %3102 = vrot.lane.b32.xlu1 %v5157_v16, %s5571_s25 }
0x16ef   :  { %v2852_v22 = vpop.xlane.xlu0 %2851 }
0x16f0   :  { %v2856_v60 = vsub.f32 %v2848_v12, %v2852_v22 }
0x16f2   :  { %v2858_v23 = vmul.f32 1.442695, %v2856_v60  ;;  %v3972_v60 = vld [vmem:[%s5533_s4 + $0x30] sm:$0xff] }
0x16f3   :  { %v2855_v5 = vpop.xlane.xlu1 %2854  ;;  %v2949_v25 = vpop.permute.xlu0 %2948 }
0x16f4   :  { %4612 = vpow2.f32 %v2858_v23  ;;  %v2857_v27 = vsub.f32 %v2849_v19, %v2855_v5  ;;  %4373 = vmatpush3.msra.mxu0 %v2949_v25  ;;  %v3973_v23 = vld [vmem:[%s5533_s4 + $0x38] sm:$0xff] }
0x16f5   :  { %4382 = vmatprep.subr.mxu0 %v4636_v11  ;;  %v4487_v5 = vpack.c.bf16 %v3973_v23, %v3972_v60  ;;  %v3996_v60 = vld [vmem:[%s5536_s8 + $0x118] sm:$0xff]  ;;  %v4013_v23 = vld [vmem:[%s5536_s8 + $0x1a0] sm:$0xff] }
0x16f6   :  { %v2860_v10 = vmul.f32 1.442695, %v2857_v27 }
0x16f7   :  { %v2873_v8 = vpop.permute.xlu1 %2872 }
0x16f8   :  { %4614 = vpow2.f32 %v2860_v10  ;;  %4368 = vmatpush3.msra.mxu1 %v2873_v8 }
0x16f9   :  { %4377 = vmatprep.subr.mxu1 %v4636_v11 }
0x16fb   :  { %v3027_v36 = vpop.permute.xlu1 %3026 }
0x16fe   :  { %v4613_v29 = vpop.eup %4612 }
0x16ff   :  { %v2862_v30 = vsel %vm160_vm2, %v4613_v29, 0.0  ;;  %v3105_v37 = vpop.permute.xlu1 %3104 }
0x1700   :  { %2863 = vadd.xlane.f32.xlu0 %v2862_v30 }
0x1702   :  { %v4615_v31 = vpop.eup %4614 }
0x1703   :  { %v2865_v32 = vsel %vm160_vm2, %v4615_v31, 0.0  ;;  %v3103_v45 = vpop.permute.xlu1 %3102 }
0x1704   :  { %2866 = vadd.xlane.f32.xlu0 %v2865_v32 }
0x171a   :  { %3024 = vrot.lane.b32.xlu0 %v5159_v48, %s5571_s25 }
0x178d   :  { %v2864_v33 = vpop.xlane.xlu0 %2863 }
0x178e   :  { %4616 = vrcp.f32 %v2864_v33 }
0x1791   :  { %v2867_v34 = vpop.xlane.xlu0 %2866 }
0x1792   :  { %4618 = vrcp.f32 %v2867_v34 }
0x1795   :  { %v3025_v41 = vpop.permute.xlu0 %3024 }
0x1798   :  { %v4617_v38 = vpop.eup %4616 }
0x1799   :  { %v2870_v15 = vmul.f32 %v4617_v38, %v4613_v29 }
0x179b   :  { %4370 = vmatmul.mubr.msk.f32.vlgmr.msra.gmra.mrb[34].mxu1 %vm160_vm2, %v2870_v15 }
0x179c   :  { %v4619_v39 = vpop.eup %4618  ;;  %4378 = vmatpush3.xpose.msk.msra.mxu1 %vm160_vm2, %v3027_v36  ;;  %4379 = vmatprep.mubr.msk.f32.mxu1 %vm4637_vm1, %v4636_v11 }
0x179d   :  { %v2871_v35 = vmul.f32 %v4619_v39, %v4615_v31  ;;  %4387 = vmatprep.subr.mxu1 %v4636_v11 }
0x179f   :  { %4375 = vmatmul.mubr.msk.f32.vlgmr.msra.gmra.mrb[32].mxu0 %vm160_vm2, %v2871_v35  ;;  %4380 = vmatmul.mubr.msk.f32.vlgmr.msra.gmra.mrb[36].mxu1 %vm160_vm2, %v3025_v41 }
0x17a0   :  { %4383 = vmatpush3.xpose.msk.msra.mxu0 %vm160_vm2, %v3105_v37  ;;  %4384 = vmatprep.mubr.msk.f32.mxu0 %vm4637_vm1, %v4636_v11 }
0x17a1   :  { %4392 = vmatprep.subr.mxu0 %v4636_v11  ;;  %4389 = vmatprep.mubr.msk.f32.mxu1 %vm4637_vm1, %v4636_v11 }
0x17a3   :  { %4385 = vmatmul.mubr.msk.f32.vlgmr.msra.gmra.mrb[34].mxu0 %vm160_vm2, %v3103_v45 }
0x17a4   :  { %4394 = vmatprep.mubr.msk.f32.mxu0 %vm4637_vm1, %v4636_v11 }
0x186e   :  { %v2944_v46 = vpop.f32.mrb[34].mxu1 }
0x186f   :  { %v4371_v47 = vpop.f32.mrb[35].mxu1 }
0x1872   :  { %v3020_v49 = vpop.f32.mrb[32].mxu0  ;;  %v3098_v50 = vpop.f32.mrb[36].mxu1 }
0x1873   :  { %v3180_v51 = vmul.f32 0.35355338, %v3098_v50  ;;  %v4376_v52 = vpop.f32.mrb[33].mxu0  ;;  %v4381_v53 = vpop.f32.mrb[37].mxu1 }
0x1875   :  { %v3182_v54 = vadd.f32 %v3180_v51, %v4799_v24 }
0x1876   :  { %v3176_v55 = vpop.f32.mrb[34].mxu0 }
0x1877   :  { %v3181_v57 = vmul.f32 0.35355338, %v3176_v55  ;;  %v4386_v59 = vpop.f32.mrb[35].mxu0  ;;  %v3184_v61 = vsel %vm160_vm2, %v3182_v54, -inf }
0x1878   :  { %3185 = vmax.xlane.f32.xlu0 %v3184_v61 }
0x1879   :  { %v3183_v62 = vadd.f32 %v3181_v57, %v4799_v24 }
0x187b   :  { %v3187_v63 = vsel %vm160_vm2, %v3183_v62, -inf }
0x187c   :  { %3188 = vmax.xlane.f32.xlu1 %v3187_v63  ;;  %v3983_v63 = vld [vmem:[%s5535_s6 + $0x48] sm:$0xff] }
0x188d   :  { %3206 = vrot.lane.b32.xlu1 %v5159_v48, %s5572_s26 }
0x1891   :  { %3360 = vrot.lane.b32.xlu1 %v5253_v3, %s5573_s1 }
0x1895   :  { %3362 = vrot.lane.b32.xlu1 %v5255_v56, %s5573_s1 }
0x1899   :  { %3370 = vrot.lane.b32.xlu1 %v3020_v49, %s5574_s30 }
0x1905   :  { %v3186_v0 = vpop.xlane.xlu0 %3185 }
0x1906   :  { %v3190_v1 = vsub.f32 %v3182_v54, %v3186_v0  ;;  %v3985_v0 = vld [vmem:[%s5535_s6 + $0x58] sm:$0xff] }
0x1908   :  { %v3192_v2 = vmul.f32 1.442695, %v3190_v1  ;;  %v4491_v1 = vpack.c.bf16 %v3985_v0, %v3983_v63  ;;  %v3980_v63 = vld [vmem:[%s5537_s10 + $0x1] ss:$0 sm:$0xff] }
0x1909   :  { %v3189_v4 = vpop.xlane.xlu1 %3188 }
0x190a   :  { %4620 = vpow2.f32 %v3192_v2  ;;  %v3191_v24 = vsub.f32 %v3183_v62, %v3189_v4  ;;  %v3982_v2 = vld [vmem:[%s5535_s6 + $0x40] sm:$0xff]  ;;  %v3984_v4 = vld [vmem:[%s5535_s6 + $0x50] sm:$0xff] }
0x190c   :  { %v3194_v58 = vmul.f32 1.442695, %v3191_v24  ;;  %v4493_v24 = vpack.c.bf16 %v3984_v4, %v3982_v2 }
0x190d   :  { %v3207_v6 = vpop.permute.xlu1 %3206 }
0x190e   :  { %4622 = vpow2.f32 %v3194_v58  ;;  %4388 = vmatpush3.msra.mxu1 %v3207_v6  ;;  %v3987_v58 = vld [vmem:[%s5535_s6 + $0x68] sm:$0xff]  ;;  %v3989_v6 = vld [vmem:[%s5535_s6 + $0x78] sm:$0xff] }
0x1911   :  { %v3361_v29 = vpop.permute.xlu1 %3360 }
0x1912   :  { %v3382_v32 = vsel %vm160_vm2, %v5213_v26, %v3361_v29  ;;  %v3975_v26 = vld [vmem:[%s5534_s5 + $0x1] ss:$0 sm:$0xff]  ;;  %v4015_v29 = vld [vmem:[%s5536_s8 + $0x1b0] sm:$0xff] }
0x1914   :  { %v4621_v7 = vpop.eup %4620 }
0x1915   :  { %v3196_v48 = vsel %vm160_vm2, %v4621_v7, 0.0  ;;  %v3363_v30 = vpop.permute.xlu1 %3362 }
0x1916   :  { %3197 = vadd.xlane.f32.xlu0 %v3196_v48  ;;  %v3383_v15 = vsel %vm160_vm2, %v5215_v28, %v3363_v30  ;;  %v4495_v48 = vpack.c.bf16 %v3989_v6, %v3987_v58  ;;  %v4016_v30 = vld [vmem:[%s5536_s8 + $0x1b8] sm:$0xff] }
0x1918   :  { %v4623_v3 = vpop.eup %4622 }
0x1919   :  { %v3199_v9 = vsel %vm160_vm2, %v4623_v3, 0.0  ;;  %v3371_v33 = vpop.permute.xlu1 %3370 }
0x191a   :  { %3200 = vadd.xlane.f32.xlu0 %v3199_v9  ;;  %v3385_v39 = vsel %vm1518_vm4, %v3383_v15, %v3371_v33  ;;  %v3999_v33 = vld [vmem:[%s5536_s8 + $0x130] sm:$0xff] }
0x1930   :  { %3282 = vrot.lane.b32.xlu0 %v5157_v16, %s5572_s26  ;;  %v3970_v16 = vld [vmem:[%s5533_s4 + $0x20] sm:$0xff] }
0x1931   :  { %v4483_v22 = vpack.c.bf16 %v3971_v21, %v3970_v16 }
0x1933   :  { %4484 = vmatprep.subr.bf16.mxu1 %v4483_v22 }
0x1934   :  { %3368 = vrot.lane.b32.xlu0 %v2944_v46, %s5574_s30 }
0x19a3   :  { %v3198_v56 = vpop.xlane.xlu0 %3197 }
0x19a4   :  { %4624 = vrcp.f32 %v3198_v56  ;;  %v4009_v56 = vld [vmem:[%s5536_s8 + $0x180] sm:$0xff] }
0x19a7   :  { %v3201_v12 = vpop.xlane.xlu0 %3200 }
0x19a8   :  { %4626 = vrcp.f32 %v3201_v12  ;;  %v4010_v12 = vld [vmem:[%s5536_s8 + $0x188] sm:$0xff] }
0x19ab   :  { %v3283_v13 = vpop.permute.xlu0 %3282 }
0x19ac   :  { %4393 = vmatpush3.msra.mxu0 %v3283_v13  ;;  %v3993_v13 = vld [vmem:[%s5536_s8 + $0x100] sm:$0xff] }
0x19ad   :  { %4492 = vmatprep.subr.bf16.mxu0 %v4491_v1  ;;  %v3981_v1 = vld [vmem:[%s5538_s11 + $0x1] ss:$0 sm:$0xff] }
0x19ae   :  { %v4625_v14 = vpop.eup %4624 }
0x19af   :  { %v3204_v17 = vmul.f32 %v4625_v14, %v4621_v7  ;;  %v3369_v31 = vpop.permute.xlu0 %3368  ;;  %v3986_v7 = vld [vmem:[%s5535_s6 + $0x60] sm:$0xff]  ;;  %v4499_v14 = vpack.c.bf16 %v4010_v12, %v4009_v56  ;;  %v4007_v56 = vld [vmem:[%s5536_s8 + $0x170] sm:$0xff]  ;;  %v4008_v12 = vld [vmem:[%s5536_s8 + $0x178] sm:$0xff] }
0x19b0   :  { %v3384_v34 = vsel %vm1518_vm4, %v3382_v32, %v3369_v31  ;;  %v4511_v32 = vpack.c.bf16 %v4016_v30, %v4015_v29 }
0x19b1   :  { %4390 = vmatmul.mubr.msk.f32.vlgmr.msra.gmra.mrb[38].mxu1 %vm160_vm2, %v3204_v17  ;;  %v3994_v17 = vld [vmem:[%s5536_s8 + $0x108] sm:$0xff] }
0x19b2   :  { %v4627_v18 = vpop.eup %4626  ;;  %4486 = vmatpush3.bf16.msra.mxu1 %v4483_v22  ;;  %v4501_v16 = vpack.c.bf16 %v3994_v17, %v3993_v13  ;;  %v3995_v22 = vld [vmem:[%s5536_s8 + $0x110] sm:$0xff]  ;;  %v4529_v13 = vpack.c.bf16 %v4008_v12, %v4007_v56 }
0x19b3   :  { %v3205_v19 = vmul.f32 %v4627_v18, %v4623_v3  ;;  %4488 = vmatprep.subr.bf16.mxu1 %v4487_v5  ;;  %v3988_v3 = vld [vmem:[%s5535_s6 + $0x70] sm:$0xff] }
0x19b4   :  { %v4497_v9 = vpack.c.bf16 %v3988_v3, %v3986_v7  ;;  %v4011_v18 = vld [vmem:[%s5536_s8 + $0x190] sm:$0xff] }
0x19b5   :  { %4395 = vmatmul.mubr.msk.f32.vlgmr.msra.gmra.mrb[36].mxu0 %vm160_vm2, %v3205_v19  ;;  %v4012_v19 = vld [vmem:[%s5536_s8 + $0x198] sm:$0xff] }
0x19b6   :  { %3622 = vmatprep.mubr.f32.mxu0 %v4636_v11  ;;  %4490 = vmatpush3.bf16.msra.mxu1 %v4487_v5  ;;  %v4503_v21 = vpack.c.bf16 %v4012_v19, %v4011_v18  ;;  %v4014_v5 = vld [vmem:[%s5536_s8 + $0x1a8] sm:$0xff] }
0x19b7   :  { %4494 = vmatpush1.bf16.msra.mxu0 %v4493_v24  ;;  %4500 = vmatprep.subr.bf16.mxu1 %v4499_v14  ;;  %v3990_v14 = vld [vmem:[%s5539_s7 + $0x2] sm:$0x3] }
0x19b8   :  { %4496 = vmatprep.subr.bf16.mxu0 %v4495_v48  ;;  %v4006_v48 = vld [vmem:[%s5536_s8 + $0x168] sm:$0xff]  ;;  %v3545_v17 = vrot.slane %v3990_v14, %v1675_v42  ;;  %v3549_v18 = vrot.slane %v3990_v14, %v1679_v44 }
0x19bb   :  { %4498 = vmatpush1.bf16.msra.mxu0 %v4497_v9 }
0x1a84   :  { %v3278_v25 = vpop.f32.mrb[38].mxu1 }
0x1a85   :  { %3376 = vrot.lane.b32.xlu0 %v3278_v25, %s5575_s19  ;;  %v4391_v27 = vpop.f32.mrb[39].mxu1  ;;  %v4505_v25 = vpack.c.bf16 %v3996_v60, %v3995_v22 }
0x1a86   :  { %v4507_v27 = vpack.c.bf16 %v4014_v5, %v4013_v23 }
0x1a88   :  { %v3354_v10 = vpop.f32.mrb[36].mxu0 }
0x1a89   :  { %3378 = vrot.lane.b32.xlu1 %v3354_v10, %s5575_s19  ;;  %v4396_v8 = vpop.f32.mrb[37].mxu0  ;;  %v3997_v10 = vld [vmem:[%s5536_s8 + $0x120] sm:$0xff] }
0x1a8a   :  { %v3998_v8 = vld [vmem:[%s5536_s8 + $0x128] sm:$0xff] }
0x1a8b   :  { %v4509_v31 = vpack.c.bf16 %v3998_v8, %v3997_v10 }
0x1af7   :  { %v3377_v36 = vpop.permute.xlu0 %3376 }
0x1af8   :  { %v3386_v38 = vsel %vm1521_vm5, %v3384_v34, %v3377_v36  ;;  %v4000_v34 = vld [vmem:[%s5536_s8 + $0x138] sm:$0xff]  ;;  %v4017_v36 = vld [vmem:[%s5536_s8 + $0x1c0] sm:$0xff] }
0x1af9   :  { %4405 = vmatprep.mubr.msk.f32.mxu1 %vm75_vm0, %v3386_v38  ;;  %v4018_v38 = vld [vmem:[%s5536_s8 + $0x1c8] sm:$0xff]  ;;  %v4513_v15 = vpack.c.bf16 %v4000_v34, %v3999_v33 }
0x1afb   :  { %v3379_v37 = vpop.permute.xlu1 %3378 }
0x1afc   :  { %v3387_v35 = vsel %vm1521_vm5, %v3385_v39, %v3379_v37  ;;  %v4515_v39 = vpack.c.bf16 %v4018_v38, %v4017_v36  ;;  %v4001_v37 = vld [vmem:[%s5536_s8 + $0x140] sm:$0xff] }
0x1afd   :  { %4406 = vmatmul.mubr.msk.f32.vlgmr.msra.gmra.mrb[40].mxu1 %vm75_vm0, %v3387_v35  ;;  %v4002_v35 = vld [vmem:[%s5536_s8 + $0x148] sm:$0xff] }
0x1afe   :  { %4502 = vmatpush3.bf16.msra.mxu1 %v4501_v16 }
0x1aff   :  { %4504 = vmatprep.subr.bf16.mxu1 %v4503_v21 }
0x1b02   :  { %4506 = vmatpush3.bf16.msra.mxu1 %v4505_v25 }
0x1b03   :  { %4508 = vmatprep.subr.bf16.mxu1 %v4507_v27 }
0x1b06   :  { %4510 = vmatpush3.bf16.msra.mxu1 %v4509_v31 }
0x1b07   :  { %4512 = vmatprep.subr.bf16.mxu1 %v4511_v32 }
0x1b0a   :  { %4514 = vmatpush3.bf16.msra.mxu1 %v4513_v15 }
0x1b0b   :  { %4516 = vmatprep.subr.bf16.mxu1 %v4515_v39 }
0x1bd0   :  { %v4407_v41 = vpop.f32.mrb[40].mxu1 }
0x1bd1   :  { %v3479_v45 = vadd.f32 %v4407_v41, %v3975_v26  ;;  %v3473_v46 = vpop.f32.mrb[41].mxu1  ;;  %v4020_v41 = vld [vmem:[%s5536_s8 + $0x1d8] sm:$0xff] }
0x1bd2   :  { %v3474_v47 = vadd.f32 %v3975_v26, %v3473_v46  ;;  %v4019_v26 = vld [vmem:[%s5536_s8 + $0x1d0] sm:$0xff] }
0x1bd3   :  { %v3483_v49 = vadd.f32 %v3479_v45, %v5148_v43  ;;  %v4517_v45 = vpack.c.bf16 %v4002_v35, %v4001_v37  ;;  %v4519_v46 = vpack.c.bf16 %v4020_v41, %v4019_v26 }
0x1bd4   :  { %v3482_v50 = vadd.f32 %v3474_v47, %v5144_v40  ;;  %v4003_v47 = vld [vmem:[%s5536_s8 + $0x150] sm:$0xff] }
0x1bd5   :  { %v3491_v28 = vsel %vm75_vm0, %v3483_v49, 0.0  ;;  %4518 = vmatpush3.bf16.msra.mxu1 %v4517_v45 }
0x1bd6   :  { %3492 = vadd.xlane.f32.xlu1 %v3491_v28  ;;  %v3488_v51 = vsel %vm75_vm0, %v3482_v50, 0.0  ;;  %v4022_v28 = vld [vmem:[%s5536_s8 + $0x1e8] sm:$0xff]  ;;  %4520 = vmatprep.subr.bf16.mxu1 %v4519_v46 }
0x1bd7   :  { %3489 = vadd.xlane.f32.xlu0 %v3488_v51 }
0x1c63   :  { %v3493_v52 = vpop.xlane.xlu1 %3492 }
0x1c64   :  { %v3495_v53 = vmul.f32 0.03125, %v3493_v52  ;;  %v3490_v54 = vpop.xlane.xlu0 %3489 }
0x1c65   :  { %v3494_v55 = vmul.f32 0.03125, %v3490_v54 }
0x1c66   :  { %v5343_v57 = vsub.f32 %v3483_v49, %v3495_v53  ;;  %v4004_v49 = vld [vmem:[%s5536_s8 + $0x158] sm:$0xff] }
0x1c67   :  { %v5345_v59 = vsub.f32 %v3482_v50, %v3494_v55  ;;  %v4021_v50 = vld [vmem:[%s5536_s8 + $0x1e0] sm:$0xff]  ;;  %v4521_v51 = vpack.c.bf16 %v4004_v49, %v4003_v47 }
0x1c68   :  { %v3499_v40 = vmul.f32 %v5343_v57, %v5343_v57  ;;  %v4523_v52 = vpack.c.bf16 %v4022_v28, %v4021_v50 }
0x1c69   :  { %v3498_v61 = vmul.f32 %v5345_v59, %v5345_v59  ;;  %4522 = vmatpush3.bf16.msra.mxu1 %v4521_v51 }
0x1c6a   :  { %v3503_v62 = vsel %vm75_vm0, %v3499_v40, 0.0  ;;  %4524 = vmatprep.subr.bf16.mxu1 %v4523_v52  ;;  %v3803_v52 = vld [vmem:[%s5543_s14] sm:$0xff] }
0x1c6b   :  { %v3500_v43 = vsel %vm75_vm0, %v3498_v61, 0.0 }
0x1c6c   :  { %3501 = vadd.xlane.f32.xlu0 %v3500_v43 }
0x1c70   :  { %3504 = vadd.xlane.f32.xlu0 %v3503_v62 }
0x1cf9   :  { %v3502_v53 = vpop.xlane.xlu0 %3501 }
0x1cfa   :  { %v3506_v54 = vmul.f32 0.03125, %v3502_v53  ;;  %v3804_v53 = vld [vmem:[%s5543_s14 + $0x8] sm:$0xff] }
0x1cfc   :  { %v3508_v55 = vadd.f32 1e-05, %v3506_v54  ;;  %v4531_v54 = vpack.c.bf16 %v3804_v53, %v3803_v52 }
0x1cfd   :  { %v3505_v61 = vpop.xlane.xlu0 %3504 }
0x1cfe   :  { %4628 = vrsqrt.f32 %v3508_v55  ;;  %v3507_v43 = vmul.f32 0.03125, %v3505_v61  ;;  %4532 = vmatprep.subr.bf16.mxu0 %v4531_v54  ;;  %v3805_v55 = vld [vmem:[%s5543_s14 + $0x10] sm:$0xff]  ;;  %v3806_v61 = vld [vmem:[%s5543_s14 + $0x18] sm:$0xff] }
0x1d00   :  { %v3509_v40 = vadd.f32 1e-05, %v3507_v43  ;;  %v4535_v43 = vpack.c.bf16 %v3806_v61, %v3805_v55 }
0x1d02   :  { %4630 = vrsqrt.f32 %v3509_v40 }
0x1d08   :  { %v4629_v62 = vpop.eup %4628 }
0x1d09   :  { %v3512_v0 = vmul.f32 %v4629_v62, %v5345_v59  ;;  %v4005_v59 = vld [vmem:[%s5536_s8 + $0x160] sm:$0xff] }
0x1d0a   :  { %v4525_v3 = vpack.c.bf16 %v4006_v48, %v4005_v59 }
0x1d0b   :  { %v3520_v2 = vmul.f32 %v3980_v63, %v3512_v0 }
0x1d0c   :  { %v4631_v4 = vpop.eup %4630  ;;  %4526 = vmatpush3.bf16.msra.mxu1 %v4525_v3 }
0x1d0d   :  { %v3528_v24 = vadd.f32 %v3981_v1, %v3520_v2  ;;  %v3513_v58 = vmul.f32 %v4631_v4, %v5343_v57  ;;  %v4023_v57 = vld [vmem:[%s5536_s8 + $0x1f0] sm:$0xff] }
0x1d0f   :  { %3991 = vmatmul.mubr.msk.f32.vlgmr.msra.gmra.mrb[38].mxu0 %vm75_vm0, %v3528_v24  ;;  %v3521_v6 = vmul.f32 %v3980_v63, %v3513_v58 }
0x1d10   :  { %3628 = vmatprep.mubr.f32.mxu0 %v4636_v11  ;;  %v4024_v11 = vld [vmem:[%s5536_s8 + $0x1f8] sm:$0xff]  ;;  %4534 = vmatpush3.bf16.msra.mxu0 %v4531_v54 }
0x1d11   :  { %v3529_v7 = vadd.f32 %v3981_v1, %v3521_v6  ;;  %v4527_v9 = vpack.c.bf16 %v4024_v11, %v4023_v57  ;;  %4536 = vmatprep.subr.bf16.mxu0 %v4535_v43  ;;  %v4030_v6 = vld [vmem:[%s5542_s13 + $0x1] ss:$0 sm:$0xff] }
0x1d13   :  { %3992 = vmatmul.mubr.msk.f32.gmra.mrb[40].mxu0 %vm75_vm0, %v3529_v7  ;;  %4528 = vmatprep.subr.bf16.mxu1 %v4527_v9  ;;  %v4031_v9 = vld [vmem:[%s5544_s15] ss:$0 sm:$0xff] }
0x1d14   :  { %4530 = vmatpush3.bf16.msra.mxu1 %v4529_v13  ;;  %4538 = vmatpush3.bf16.msra.mxu0 %v4535_v43 }
0x1de2   :  { %v3624_v19 = vpop.f32.mrb[38].mxu0 }
0x1de3   :  { %v3625_v16 = vadd.f32 %v3624_v19, %v3545_v17  ;;  %v3626_v21 = vpop.f32.mrb[39].mxu0 }
0x1de4   :  { %v3627_v22 = vadd.f32 %v3626_v21, %v3549_v18 }
0x1de5   :  { %v3635_v5 = vmax.f32 %v3625_v16, 0.0 }
0x1de6   :  { %v3636_v60 = vmax.f32 %v3627_v22, 0.0  ;;  %v3630_v23 = vpop.f32.mrb[40].mxu0 }
0x1de7   :  { %v3631_v25 = vadd.f32 %v3630_v23, %v3545_v17  ;;  %v3632_v27 = vpop.f32.mrb[41].mxu0 }
0x1de8   :  { %v3633_v10 = vadd.f32 %v3632_v27, %v3549_v18  ;;  %3744 = vmatprep.mubr.f32.mxu1 %v3636_v60 }
0x1de9   :  { %3745 = vmatmul.mubr.f32.vlgmr.msra.gmra.mrb[42].mxu1 %v3635_v5  ;;  %v3637_v29 = vmax.f32 %v3631_v25, 0.0 }
0x1dea   :  { %v3638_v8 = vmax.f32 %v3633_v10, 0.0 }
0x1dec   :  { %3749 = vmatprep.mubr.f32.mxu1 %v3638_v8 }
0x1ded   :  { %3750 = vmatmul.mubr.f32.gmra.mrb[44].mxu1 %v3637_v29 }
0x1ebc   :  { %v4192_v42 = vpop.f32.mrb[42].mxu1 }
0x1ebd   :  { %v4193_v44 = vpop.f32.mrb[43].mxu1 }
0x1ebe   :  { %v4194_v30 = vadd.f32 %v4193_v44, %v4192_v42 }
0x1ec0   :  { %v3747_v31 = vadd.f32 %v4194_v30, %v4026_v20  ;;  %v4195_v32 = vpop.f32.mrb[44].mxu1 }
0x1ec1   :  { %v4196_v33 = vpop.f32.mrb[45].mxu1 }
0x1ec2   :  { %v4197_v34 = vadd.f32 %v4196_v33, %v4195_v32  ;;  %v3755_v36 = vadd.f32 %v3747_v31, %v3528_v24  ;;  %v4029_v24 = vld [vmem:[%s5541_s12 + $0x1] ss:$0 sm:$0xff] }
0x1ec4   :  { %v3752_v38 = vadd.f32 %v4197_v34, %v4026_v20  ;;  %v3761_v15 = vsel %vm75_vm0, %v3755_v36, 0.0 }
0x1ec5   :  { %3762 = vadd.xlane.f32.xlu1 %v3761_v15 }
0x1ec6   :  { %v3756_v39 = vadd.f32 %v3752_v38, %v3529_v7 }
0x1ec8   :  { %v3764_v37 = vsel %vm75_vm0, %v3756_v39, 0.0 }
0x1ec9   :  { %3765 = vadd.xlane.f32.xlu0 %v3764_v37 }
0x1f52   :  { %v3763_v35 = vpop.xlane.xlu1 %3762 }
0x1f53   :  { %v3767_v26 = vmul.f32 0.03125, %v3763_v35 }
0x1f55   :  { %v3769_v41 = vsub.f32 %v3755_v36, %v3767_v26 }
0x1f56   :  { %v3766_v45 = vpop.xlane.xlu0 %3765 }
0x1f57   :  { %v3768_v46 = vmul.f32 0.03125, %v3766_v45  ;;  %v3771_v47 = vmul.f32 %v3769_v41, %v3769_v41 }
0x1f59   :  { %v3770_v49 = vsub.f32 %v3756_v39, %v3768_v46  ;;  %v3773_v50 = vsel %vm75_vm0, %v3771_v47, 0.0 }
0x1f5a   :  { %3774 = vadd.xlane.f32.xlu1 %v3773_v50 }
0x1f5b   :  { %v3772_v28 = vmul.f32 %v3770_v49, %v3770_v49 }
0x1f5d   :  { %v3776_v51 = vsel %vm75_vm0, %v3772_v28, 0.0 }
0x1f5e   :  { %3777 = vadd.xlane.f32.xlu0 %v3776_v51 }
0x1fe7   :  { %v3775_v40 = vpop.xlane.xlu1 %3774 }
0x1fe8   :  { %v3779_v62 = vmul.f32 0.03125, %v3775_v40 }
0x1fea   :  { %v3781_v63 = vadd.f32 1e-05, %v3779_v62 }
0x1feb   :  { %v3778_v0 = vpop.xlane.xlu0 %3777 }
0x1fec   :  { %4632 = vrsqrt.f32 %v3781_v63  ;;  %v3780_v1 = vmul.f32 0.03125, %v3778_v0 }
0x1fee   :  { %v3782_v2 = vadd.f32 1e-05, %v3780_v1 }
0x1ff0   :  { %4634 = vrsqrt.f32 %v3782_v2 }
0x1ff6   :  { %v4633_v4 = vpop.eup %4632 }
0x1ff7   :  { %v3785_v58 = vmul.f32 %v4633_v4, %v3769_v41 }
0x1ff9   :  { %v3793_v7 = vmul.f32 %v4029_v24, %v3785_v58 }
0x1ffa   :  { %v4635_v59 = vpop.eup %4634 }
0x1ffb   :  { %v3786_v48 = vmul.f32 %v4635_v59, %v3770_v49  ;;  %v3801_v3 = vadd.f32 %v4030_v6, %v3793_v7 }
0x1ffd   :  { %v3794_v57 = vmul.f32 %v4029_v24, %v3786_v48  ;;  %4416 = vmatprep.mubr.msk.f32.mxu0 %vm75_vm0, %v3801_v3 }
0x1fff   :  { %v3802_v11 = vadd.f32 %v4030_v6, %v3794_v57 }
0x2001   :  { %4417 = vmatmul.mubr.msk.f32.vlgmr.msra.gmra.mrb[42].mxu0 %vm75_vm0, %v3802_v11 }
0x20d4   :  { %v4418_v56 = vpop.f32.mrb[42].mxu0 }
0x20d5   :  { %v3892_v12 = vadd.f32 %v4418_v56, %v4031_v9  ;;  %v3886_v13 = vpop.f32.mrb[43].mxu0 }
0x20d6   :  { %v3887_v14 = vadd.f32 %v4031_v9, %v3886_v13 }
0x20d7   :  { %3896 = vst.msk [vmem:[%s5545_s16 + $0x8] sm:$0xff] %vm1518_vm4, %v3892_v12 }
0x20d8   :  { %3895 = vst.msk [vmem:[%s5545_s16] sm:$0xff] %vm1518_vm4, %v3887_v14 }

</bundles_post_ra>
